<compile_context>
chip_gen: v7x
topology: tpu7x:2x2x1
jax: 0.10.0
libtpu: 0.0.40
codegen_flags: <defaults>
</compile_context>

<pallas_src>
import numpy as np
import jax
import jax.numpy as jnp
from jax import lax
from jax.experimental import pallas as pl
from jax.experimental.pallas import tpu as pltpu

# --- model hyperparameters (small, consistent with a CLIP text config) ---
S = 8            # sequence length
D = 32           # hidden size
H = 4            # attention heads
DH = D // H      # head dim
I = 4 * D        # MLP intermediate size (=128)
NUM_LAYERS = 2
VOCAB = 64
MAX_POS = 16
EPS = 1e-5
NEG_INF = float(np.finfo(np.float32).min)
ATTN_SCALE = float(DH) ** -0.5

# Packed vector-param slab: [TOTAL_ROWS, VEC_W] f32, one 8-row block per layer
# plus two rows for the final LayerNorm.
VEC_W = max(I, 3 * D)                      # 128 lanes (lane-dense rows)
ROWS_PER_LAYER = 8
R_LN1W, R_LN1B, R_LN2W, R_LN2B, R_BO, R_B2, R_B1, R_BQKV = range(ROWS_PER_LAYER)
FINAL_BASE = NUM_LAYERS * ROWS_PER_LAYER
TOTAL_ROWS = FINAL_BASE + 2


def _layernorm(x, w, b):
    mu = jnp.mean(x, axis=-1, keepdims=True)
    var = jnp.mean(jnp.square(x - mu), axis=-1, keepdims=True)
    return (x - mu) * lax.rsqrt(var + EPS) * w + b


# ----------------------------- fused Pallas kernel --------------------------
def clip_text_kernel(ids_ref,                      # SMEM [S] int32
                     tok_emb_ref, pos_emb_ref,     # VMEM [VOCAB,D] f32, [S,D] f32
                     wqkv_ref, wo_ref, w1_ref, w2_ref,   # VMEM bf16 weight stacks
                     vec_ref,                      # VMEM [TOTAL_ROWS, VEC_W] f32
                     out_ref, pooled_ref):         # VMEM [S,D] f32, [1,D] f32
    bf16 = jnp.bfloat16

    def vrow(r, width=D):
        # one lane-dense parameter row, [1, width] f32
        return vec_ref[r:r + 1, 0:width]

    # ---- embeddings: token gather (dynamic row loads) + positional add ----
    tok_rows = [tok_emb_ref[pl.ds(ids_ref[i], 1), :] for i in range(S)]
    x = jnp.concatenate(tok_rows, axis=0) + pos_emb_ref[...]        # [S, D] f32

    # causal mask built ONCE for all layers / heads
    row = lax.broadcasted_iota(jnp.int32, (S, S), 0)
    col = lax.broadcasted_iota(jnp.int32, (S, S), 1)
    causal = col > row                                              # [S, S] bool

    for l in range(NUM_LAYERS):                     # static unrolled (2 layers)
        base = l * ROWS_PER_LAYER

        # ---- self-attention block ----
        h1 = _layernorm(x, vrow(base + R_LN1W), vrow(base + R_LN1B))
        # fused lane-dense QKV projection: one [S,32]x[32,96] bf16 MXU op
        qkv = jnp.dot(h1.astype(bf16), wqkv_ref[l],
                      preferred_element_type=jnp.float32)
        qkv = qkv + vrow(base + R_BQKV, 3 * D)                      # [S, 3D] f32

        head_outs = []
        for h in range(H):                          # per-head attention (DH=8)
            q_h = (qkv[:, h * DH:(h + 1) * DH] * ATTN_SCALE).astype(bf16)
            k_h = qkv[:, D + h * DH: D + (h + 1) * DH].astype(bf16)
            v_h = qkv[:, 2 * D + h * DH: 2 * D + (h + 1) * DH].astype(bf16)

            s = lax.dot_general(q_h, k_h, (((1,), (1,)), ((), ())),
                                preferred_element_type=jnp.float32)  # [S, S]
            s = jnp.where(causal, NEG_INF, s)
            m = jnp.max(s, axis=-1, keepdims=True)
            p = jnp.exp(s - m)
            p = p * pl.reciprocal(jnp.sum(p, axis=-1, keepdims=True), approx=True)
            head_outs.append(jnp.dot(p.astype(bf16), v_h,
                                     preferred_element_type=jnp.float32))  # [S, DH]

        attn = jnp.concatenate(head_outs, axis=-1)                  # [S, D] heads->lanes
        attn = jnp.dot(attn.astype(bf16), wo_ref[l],
                       preferred_element_type=jnp.float32) + vrow(base + R_BO)
        x = x + attn

        # ---- MLP block (quick_gelu) ----
        h2 = _layernorm(x, vrow(base + R_LN2W), vrow(base + R_LN2B))
        z = jnp.dot(h2.astype(bf16), w1_ref[l],
                    preferred_element_type=jnp.float32) + vrow(base + R_B1, I)
        z = z * jax.nn.sigmoid(1.702 * z)
        z = jnp.dot(z.astype(bf16), w2_ref[l],
                    preferred_element_type=jnp.float32) + vrow(base + R_B2)
        x = x + z

    # ---- final LayerNorm (fused) ----
    h_final = _layernorm(x, vrow(FINAL_BASE), vrow(FINAL_BASE + 1))
    out_ref[...] = h_final

    # ---- pooled output: row at argmax(ids) (first max, like torch.argmax) ----
    best_val = ids_ref[0]
    best_idx = jnp.int32(0)
    for i in range(1, S):
        v = ids_ref[i]
        upd = v > best_val
        best_idx = jnp.where(upd, jnp.int32(i), best_idx)
        best_val = jnp.where(upd, v, best_val)
    rid = lax.broadcasted_iota(jnp.int32, (S, 1), 0)
    pooled_ref[...] = jnp.sum(jnp.where(rid == best_idx, h_final, 0.0),
                              axis=0, keepdims=True)


# ------------------------- parameter initialization ------------------------
def init_params(key):
    keys = iter(jax.random.split(key, 32))

    def normal(shape, scale=0.02):
        return (scale * jax.random.normal(next(keys), shape)).astype(jnp.float32)

    ones = lambda s: jnp.ones(s, jnp.float32)
    zeros = lambda s: jnp.zeros(s, jnp.float32)

    params = {
        "token_emb": normal((VOCAB, D)),
        "pos_emb": normal((MAX_POS, D)),
        "final_ln_w": ones((D,)),
        "final_ln_b": zeros((D,)),
        "layers": [],
    }
    for _ in range(NUM_LAYERS):
        params["layers"].append(dict(
            ln1_w=ones((D,)), ln1_b=zeros((D,)),
            wq=normal((D, D)), bq=zeros((D,)),
            wk=normal((D, D)), bk=zeros((D,)),
            wv=normal((D, D)), bv=zeros((D,)),
            wo=normal((D, D)), bo=zeros((D,)),
            ln2_w=ones((D,)), ln2_b=zeros((D,)),
            w1=normal((D, I)), b1=zeros((I,)),
            w2=normal((I, D)), b2=zeros((D,)),
        ))
    return params


def pack_params(params):
    """Pack all weights into a few lane-dense kernel buffers (done once)."""
    def pad_row(v):
        v = jnp.asarray(v, jnp.float32).reshape(1, -1)
        return jnp.pad(v, ((0, 0), (0, VEC_W - v.shape[1])))

    wqkv, wo, w1, w2, vec_rows = [], [], [], [], []
    for p in params["layers"]:
        wqkv.append(jnp.concatenate([p["wq"], p["wk"], p["wv"]], axis=1))  # [D, 3D]
        wo.append(p["wo"])
        w1.append(p["w1"])
        w2.append(p["w2"])
        rows = [None] * ROWS_PER_LAYER
        rows[R_LN1W] = pad_row(p["ln1_w"]); rows[R_LN1B] = pad_row(p["ln1_b"])
        rows[R_LN2W] = pad_row(p["ln2_w"]); rows[R_LN2B] = pad_row(p["ln2_b"])
        rows[R_BO] = pad_row(p["bo"]);      rows[R_B2] = pad_row(p["b2"])
        rows[R_B1] = pad_row(p["b1"])
        rows[R_BQKV] = pad_row(jnp.concatenate([p["bq"], p["bk"], p["bv"]]))
        vec_rows.extend(rows)
    vec_rows.append(pad_row(params["final_ln_w"]))
    vec_rows.append(pad_row(params["final_ln_b"]))

    return {
        "token_emb": params["token_emb"].astype(jnp.float32),   # [VOCAB, D]
        "pos_emb": params["pos_emb"][:S].astype(jnp.float32),   # [S, D]
        "wqkv": jnp.stack(wqkv).astype(jnp.bfloat16),           # [L, D, 3D]
        "wo": jnp.stack(wo).astype(jnp.bfloat16),               # [L, D, D]
        "w1": jnp.stack(w1).astype(jnp.bfloat16),               # [L, D, I]
        "w2": jnp.stack(w2).astype(jnp.bfloat16),               # [L, I, D]
        "vec": jnp.concatenate(vec_rows, axis=0),               # [TOTAL_ROWS, VEC_W] f32
    }


# ------------------------------- forward -----------------------------------
# TODO(synk): the PyTorch forward also allows torch.Tensor entries inside
# input_ids (precomputed token embeddings substituted via host-side Python type
# inspection); only the pure token-id path is implemented here.
@jax.jit
def clip_forward(packed, input_ids):
    ids = input_ids[0].astype(jnp.int32)                         # [S], batch is 1

    vmem = pl.BlockSpec(memory_space=pltpu.MemorySpace.VMEM)
    smem = pl.BlockSpec(memory_space=pltpu.MemorySpace.SMEM)

    h, pooled = pl.pallas_call(
        clip_text_kernel,
        in_specs=[smem, vmem, vmem, vmem, vmem, vmem, vmem, vmem],
        out_specs=(vmem, vmem),
        out_shape=(jax.ShapeDtypeStruct((S, D), jnp.float32),
                   jax.ShapeDtypeStruct((1, D), jnp.float32)),
    )(ids, packed["token_emb"], packed["pos_emb"],
      packed["wqkv"], packed["wo"], packed["w1"], packed["w2"], packed["vec"])

    last_hidden_state = h[None]                                   # [1, S, D]
    pooled_output = pooled                                        # [1, D]
    return last_hidden_state, pooled_output


if __name__ == "__main__":
    key = jax.random.PRNGKey(0)
    params = init_params(key)
    packed = pack_params(params)

    # batch=1, seq=8 token ids; last token has the largest id ("EOT"-style)
    input_ids = jnp.array([[5, 12, 7, 30, 2, 9, 1, 63]], dtype=jnp.int32)

    last_hidden_state, pooled_output = clip_forward(packed, input_ids)
    jax.block_until_ready((last_hidden_state, pooled_output))

    assert last_hidden_state.shape == (1, S, D)
    assert pooled_output.shape == (1, D)
    assert bool(jnp.all(jnp.isfinite(last_hidden_state)))
    assert bool(jnp.all(jnp.isfinite(pooled_output)))
    print("KERNEL_OK")
</pallas_src>

<mosaic_0001>
module attributes {stable_mosaic.version = 11 : i64} {
  func.func @clip_text_kernel(%arg0: memref<8xi32, #tpu.memory_space<smem>>, %arg1: memref<64x32xf32, #tpu.memory_space<vmem>>, %arg2: memref<8x32xf32, #tpu.memory_space<vmem>>, %arg3: memref<2x32x96xbf16, #tpu.memory_space<vmem>>, %arg4: memref<2x32x32xbf16, #tpu.memory_space<vmem>>, %arg5: memref<2x32x128xbf16, #tpu.memory_space<vmem>>, %arg6: memref<2x128x32xbf16, #tpu.memory_space<vmem>>, %arg7: memref<18x128xf32, #tpu.memory_space<vmem>>, %arg8: memref<8x32xf32, #tpu.memory_space<vmem>>, %arg9: memref<1x32xf32, #tpu.memory_space<vmem>>) attributes {dimension_semantics = [], scalar_prefetch = 0 : i64, scratch_operands = 0 : i64, tpu.core_type = #tpu.core_type<tc>} {
    %c0 = arith.constant 0 : index
    %0 = memref.load %arg0[%c0] : memref<8xi32, #tpu.memory_space<smem>>
    %1 = arith.index_cast %0 : i32 to index
    %c0_0 = arith.constant 0 : index
    %2 = vector.load %arg1[%1, %c0_0] : memref<64x32xf32, #tpu.memory_space<vmem>>, vector<1x32xf32>
    %c1 = arith.constant 1 : index
    %3 = memref.load %arg0[%c1] : memref<8xi32, #tpu.memory_space<smem>>
    %4 = arith.index_cast %3 : i32 to index
    %c0_1 = arith.constant 0 : index
    %5 = vector.load %arg1[%4, %c0_1] : memref<64x32xf32, #tpu.memory_space<vmem>>, vector<1x32xf32>
    %c2 = arith.constant 2 : index
    %6 = memref.load %arg0[%c2] : memref<8xi32, #tpu.memory_space<smem>>
    %7 = arith.index_cast %6 : i32 to index
    %c0_2 = arith.constant 0 : index
    %8 = vector.load %arg1[%7, %c0_2] : memref<64x32xf32, #tpu.memory_space<vmem>>, vector<1x32xf32>
    %c3 = arith.constant 3 : index
    %9 = memref.load %arg0[%c3] : memref<8xi32, #tpu.memory_space<smem>>
    %10 = arith.index_cast %9 : i32 to index
    %c0_3 = arith.constant 0 : index
    %11 = vector.load %arg1[%10, %c0_3] : memref<64x32xf32, #tpu.memory_space<vmem>>, vector<1x32xf32>
    %c4 = arith.constant 4 : index
    %12 = memref.load %arg0[%c4] : memref<8xi32, #tpu.memory_space<smem>>
    %13 = arith.index_cast %12 : i32 to index
    %c0_4 = arith.constant 0 : index
    %14 = vector.load %arg1[%13, %c0_4] : memref<64x32xf32, #tpu.memory_space<vmem>>, vector<1x32xf32>
    %c5 = arith.constant 5 : index
    %15 = memref.load %arg0[%c5] : memref<8xi32, #tpu.memory_space<smem>>
    %16 = arith.index_cast %15 : i32 to index
    %c0_5 = arith.constant 0 : index
    %17 = vector.load %arg1[%16, %c0_5] : memref<64x32xf32, #tpu.memory_space<vmem>>, vector<1x32xf32>
    %c6 = arith.constant 6 : index
    %18 = memref.load %arg0[%c6] : memref<8xi32, #tpu.memory_space<smem>>
    %19 = arith.index_cast %18 : i32 to index
    %c0_6 = arith.constant 0 : index
    %20 = vector.load %arg1[%19, %c0_6] : memref<64x32xf32, #tpu.memory_space<vmem>>, vector<1x32xf32>
    %c7 = arith.constant 7 : index
    %21 = memref.load %arg0[%c7] : memref<8xi32, #tpu.memory_space<smem>>
    %22 = arith.index_cast %21 : i32 to index
    %c0_7 = arith.constant 0 : index
    %23 = vector.load %arg1[%22, %c0_7] : memref<64x32xf32, #tpu.memory_space<vmem>>, vector<1x32xf32>
    %24 = tpu.concatenate %2, %5, %8, %11, %14, %17, %20, %23 in 0 : vector<1x32xf32>, vector<1x32xf32>, vector<1x32xf32>, vector<1x32xf32>, vector<1x32xf32>, vector<1x32xf32>, vector<1x32xf32>, vector<1x32xf32> -> vector<8x32xf32>
    %c0_8 = arith.constant 0 : index
    %c0_9 = arith.constant 0 : index
    %25 = vector.load %arg2[%c0_8, %c0_9] : memref<8x32xf32, #tpu.memory_space<vmem>>, vector<8x32xf32>
    %26 = arith.addf %24, %25 : vector<8x32xf32>
    %27 = tpu.iota {dimensions = array<i32: 0>} : vector<8x8xi32>
    %28 = tpu.iota {dimensions = array<i32: 1>} : vector<8x8xi32>
    %29 = arith.cmpi sgt, %28, %27 : vector<8x8xi32>
    %c0_10 = arith.constant 0 : index
    %c0_11 = arith.constant 0 : index
    %30 = vector.load %arg7[%c0_10, %c0_11] : memref<18x128xf32, #tpu.memory_space<vmem>>, vector<1x32xf32>
    %c1_12 = arith.constant 1 : index
    %c0_13 = arith.constant 0 : index
    %31 = vector.load %arg7[%c1_12, %c0_13] : memref<18x128xf32, #tpu.memory_space<vmem>>, vector<1x32xf32>
    %cst = arith.constant dense<0.000000e+00> : vector<8xf32>
    %32 = vector.multi_reduction <add>, %26, %cst [1] : vector<8x32xf32> to vector<8xf32>
    %33 = vector.shape_cast %32 : vector<8xf32> to vector<8x1xf32>
    %cst_14 = arith.constant 3.200000e+01 : f32
    %34 = vector.broadcast %cst_14 : f32 to vector<8x1xf32>
    %35 = arith.divf %33, %34 : vector<8x1xf32>
    %36 = vector.broadcast %35 : vector<8x1xf32> to vector<8x32xf32>
    %37 = arith.subf %26, %36 : vector<8x32xf32>
    %38 = arith.mulf %37, %37 : vector<8x32xf32>
    %cst_15 = arith.constant dense<0.000000e+00> : vector<8xf32>
    %39 = vector.multi_reduction <add>, %38, %cst_15 [1] : vector<8x32xf32> to vector<8xf32>
    %40 = vector.shape_cast %39 : vector<8xf32> to vector<8x1xf32>
    %cst_16 = arith.constant 3.200000e+01 : f32
    %41 = vector.broadcast %cst_16 : f32 to vector<8x1xf32>
    %42 = arith.divf %40, %41 : vector<8x1xf32>
    %43 = vector.broadcast %35 : vector<8x1xf32> to vector<8x32xf32>
    %44 = arith.subf %26, %43 : vector<8x32xf32>
    %cst_17 = arith.constant 9.99999974E-6 : f32
    %45 = vector.broadcast %cst_17 : f32 to vector<8x1xf32>
    %46 = arith.addf %42, %45 : vector<8x1xf32>
    %47 = math.rsqrt %46 : vector<8x1xf32>
    %48 = vector.broadcast %47 : vector<8x1xf32> to vector<8x32xf32>
    %49 = arith.mulf %44, %48 : vector<8x32xf32>
    %50 = vector.broadcast %30 : vector<1x32xf32> to vector<8x32xf32>
    %51 = arith.mulf %49, %50 : vector<8x32xf32>
    %52 = vector.broadcast %31 : vector<1x32xf32> to vector<8x32xf32>
    %53 = arith.addf %51, %52 : vector<8x32xf32>
    %54 = arith.truncf %53 : vector<8x32xf32> to vector<8x32xbf16>
    %c0_18 = arith.constant 0 : index
    %c0_19 = arith.constant 0 : index
    %c0_20 = arith.constant 0 : index
    %55 = vector.load %arg3[%c0_18, %c0_19, %c0_20] : memref<2x32x96xbf16, #tpu.memory_space<vmem>>, vector<1x32x96xbf16>
    %56 = vector.shape_cast %55 : vector<1x32x96xbf16> to vector<32x96xbf16>
    %cst_21 = arith.constant dense<0.000000e+00> : vector<8x96xf32>
    %57 = tpu.matmul %54, %56, %cst_21 {dimension_numbers = #tpu.dot_dimension_numbers<[1], [0], [0], [1], [0, 0, 1, 1], [], []>} : vector<8x32xbf16>, vector<32x96xbf16>, vector<8x96xf32> -> vector<8x96xf32>
    %c7_22 = arith.constant 7 : index
    %c0_23 = arith.constant 0 : index
    %58 = vector.load %arg7[%c7_22, %c0_23] : memref<18x128xf32, #tpu.memory_space<vmem>>, vector<1x96xf32>
    %59 = vector.broadcast %58 : vector<1x96xf32> to vector<8x96xf32>
    %60 = arith.addf %57, %59 : vector<8x96xf32>
    %61 = vector.extract_strided_slice %60 {offsets = [0, 0], sizes = [8, 8], strides = [1, 1]} : vector<8x96xf32> to vector<8x8xf32>
    %cst_24 = arith.constant 0.353553385 : f32
    %62 = vector.broadcast %cst_24 : f32 to vector<8x8xf32>
    %63 = arith.mulf %61, %62 : vector<8x8xf32>
    %64 = arith.truncf %63 : vector<8x8xf32> to vector<8x8xbf16>
    %65 = vector.extract_strided_slice %60 {offsets = [0, 32], sizes = [8, 8], strides = [1, 1]} : vector<8x96xf32> to vector<8x8xf32>
    %66 = arith.truncf %65 : vector<8x8xf32> to vector<8x8xbf16>
    %67 = vector.extract_strided_slice %60 {offsets = [0, 64], sizes = [8, 8], strides = [1, 1]} : vector<8x96xf32> to vector<8x8xf32>
    %68 = arith.truncf %67 : vector<8x8xf32> to vector<8x8xbf16>
    %cst_25 = arith.constant dense<0.000000e+00> : vector<8x8xf32>
    %69 = tpu.matmul %64, %66, %cst_25 {dimension_numbers = #tpu.dot_dimension_numbers<[1], [1], [0], [0], [0, 0, 1, 0], [], []>} : vector<8x8xbf16>, vector<8x8xbf16>, vector<8x8xf32> -> vector<8x8xf32>
    %cst_26 = arith.constant -3.40282347E+38 : f32
    %70 = vector.broadcast %cst_26 : f32 to vector<8x8xf32>
    %71 = arith.select %29, %70, %69 : vector<8x8xi1>, vector<8x8xf32>
    %cst_27 = arith.constant dense<0xFF800000> : vector<8xf32>
    %72 = vector.multi_reduction <maximumf>, %71, %cst_27 [1] : vector<8x8xf32> to vector<8xf32>
    %73 = vector.shape_cast %72 : vector<8xf32> to vector<8x1xf32>
    %74 = vector.broadcast %73 : vector<8x1xf32> to vector<8x8xf32>
    %75 = arith.subf %71, %74 : vector<8x8xf32>
    %76 = math.exp %75 : vector<8x8xf32>
    %cst_28 = arith.constant dense<0.000000e+00> : vector<8xf32>
    %77 = vector.multi_reduction <add>, %76, %cst_28 [1] : vector<8x8xf32> to vector<8xf32>
    %78 = vector.shape_cast %77 : vector<8xf32> to vector<8x1xf32>
    %79 = tpu.reciprocal %78 {approx = true} : vector<8x1xf32> -> vector<8x1xf32>
    %80 = vector.broadcast %79 : vector<8x1xf32> to vector<8x8xf32>
    %81 = arith.mulf %76, %80 : vector<8x8xf32>
    %82 = arith.truncf %81 : vector<8x8xf32> to vector<8x8xbf16>
    %cst_29 = arith.constant dense<0.000000e+00> : vector<8x8xf32>
    %83 = tpu.matmul %82, %68, %cst_29 {dimension_numbers = #tpu.dot_dimension_numbers<[1], [0], [0], [1], [0, 0, 1, 1], [], []>} : vector<8x8xbf16>, vector<8x8xbf16>, vector<8x8xf32> -> vector<8x8xf32>
    %84 = vector.extract_strided_slice %60 {offsets = [0, 8], sizes = [8, 8], strides = [1, 1]} : vector<8x96xf32> to vector<8x8xf32>
    %cst_30 = arith.constant 0.353553385 : f32
    %85 = vector.broadcast %cst_30 : f32 to vector<8x8xf32>
    %86 = arith.mulf %84, %85 : vector<8x8xf32>
    %87 = arith.truncf %86 : vector<8x8xf32> to vector<8x8xbf16>
    %88 = vector.extract_strided_slice %60 {offsets = [0, 40], sizes = [8, 8], strides = [1, 1]} : vector<8x96xf32> to vector<8x8xf32>
    %89 = arith.truncf %88 : vector<8x8xf32> to vector<8x8xbf16>
    %90 = vector.extract_strided_slice %60 {offsets = [0, 72], sizes = [8, 8], strides = [1, 1]} : vector<8x96xf32> to vector<8x8xf32>
    %91 = arith.truncf %90 : vector<8x8xf32> to vector<8x8xbf16>
    %cst_31 = arith.constant dense<0.000000e+00> : vector<8x8xf32>
    %92 = tpu.matmul %87, %89, %cst_31 {dimension_numbers = #tpu.dot_dimension_numbers<[1], [1], [0], [0], [0, 0, 1, 0], [], []>} : vector<8x8xbf16>, vector<8x8xbf16>, vector<8x8xf32> -> vector<8x8xf32>
    %cst_32 = arith.constant -3.40282347E+38 : f32
    %93 = vector.broadcast %cst_32 : f32 to vector<8x8xf32>
    %94 = arith.select %29, %93, %92 : vector<8x8xi1>, vector<8x8xf32>
    %cst_33 = arith.constant dense<0xFF800000> : vector<8xf32>
    %95 = vector.multi_reduction <maximumf>, %94, %cst_33 [1] : vector<8x8xf32> to vector<8xf32>
    %96 = vector.shape_cast %95 : vector<8xf32> to vector<8x1xf32>
    %97 = vector.broadcast %96 : vector<8x1xf32> to vector<8x8xf32>
    %98 = arith.subf %94, %97 : vector<8x8xf32>
    %99 = math.exp %98 : vector<8x8xf32>
    %cst_34 = arith.constant dense<0.000000e+00> : vector<8xf32>
    %100 = vector.multi_reduction <add>, %99, %cst_34 [1] : vector<8x8xf32> to vector<8xf32>
    %101 = vector.shape_cast %100 : vector<8xf32> to vector<8x1xf32>
    %102 = tpu.reciprocal %101 {approx = true} : vector<8x1xf32> -> vector<8x1xf32>
    %103 = vector.broadcast %102 : vector<8x1xf32> to vector<8x8xf32>
    %104 = arith.mulf %99, %103 : vector<8x8xf32>
    %105 = arith.truncf %104 : vector<8x8xf32> to vector<8x8xbf16>
    %cst_35 = arith.constant dense<0.000000e+00> : vector<8x8xf32>
    %106 = tpu.matmul %105, %91, %cst_35 {dimension_numbers = #tpu.dot_dimension_numbers<[1], [0], [0], [1], [0, 0, 1, 1], [], []>} : vector<8x8xbf16>, vector<8x8xbf16>, vector<8x8xf32> -> vector<8x8xf32>
    %107 = vector.extract_strided_slice %60 {offsets = [0, 16], sizes = [8, 8], strides = [1, 1]} : vector<8x96xf32> to vector<8x8xf32>
    %cst_36 = arith.constant 0.353553385 : f32
    %108 = vector.broadcast %cst_36 : f32 to vector<8x8xf32>
    %109 = arith.mulf %107, %108 : vector<8x8xf32>
    %110 = arith.truncf %109 : vector<8x8xf32> to vector<8x8xbf16>
    %111 = vector.extract_strided_slice %60 {offsets = [0, 48], sizes = [8, 8], strides = [1, 1]} : vector<8x96xf32> to vector<8x8xf32>
    %112 = arith.truncf %111 : vector<8x8xf32> to vector<8x8xbf16>
    %113 = vector.extract_strided_slice %60 {offsets = [0, 80], sizes = [8, 8], strides = [1, 1]} : vector<8x96xf32> to vector<8x8xf32>
    %114 = arith.truncf %113 : vector<8x8xf32> to vector<8x8xbf16>
    %cst_37 = arith.constant dense<0.000000e+00> : vector<8x8xf32>
    %115 = tpu.matmul %110, %112, %cst_37 {dimension_numbers = #tpu.dot_dimension_numbers<[1], [1], [0], [0], [0, 0, 1, 0], [], []>} : vector<8x8xbf16>, vector<8x8xbf16>, vector<8x8xf32> -> vector<8x8xf32>
    %cst_38 = arith.constant -3.40282347E+38 : f32
    %116 = vector.broadcast %cst_38 : f32 to vector<8x8xf32>
    %117 = arith.select %29, %116, %115 : vector<8x8xi1>, vector<8x8xf32>
    %cst_39 = arith.constant dense<0xFF800000> : vector<8xf32>
    %118 = vector.multi_reduction <maximumf>, %117, %cst_39 [1] : vector<8x8xf32> to vector<8xf32>
    %119 = vector.shape_cast %118 : vector<8xf32> to vector<8x1xf32>
    %120 = vector.broadcast %119 : vector<8x1xf32> to vector<8x8xf32>
    %121 = arith.subf %117, %120 : vector<8x8xf32>
    %122 = math.exp %121 : vector<8x8xf32>
    %cst_40 = arith.constant dense<0.000000e+00> : vector<8xf32>
    %123 = vector.multi_reduction <add>, %122, %cst_40 [1] : vector<8x8xf32> to vector<8xf32>
    %124 = vector.shape_cast %123 : vector<8xf32> to vector<8x1xf32>
    %125 = tpu.reciprocal %124 {approx = true} : vector<8x1xf32> -> vector<8x1xf32>
    %126 = vector.broadcast %125 : vector<8x1xf32> to vector<8x8xf32>
    %127 = arith.mulf %122, %126 : vector<8x8xf32>
    %128 = arith.truncf %127 : vector<8x8xf32> to vector<8x8xbf16>
    %cst_41 = arith.constant dense<0.000000e+00> : vector<8x8xf32>
    %129 = tpu.matmul %128, %114, %cst_41 {dimension_numbers = #tpu.dot_dimension_numbers<[1], [0], [0], [1], [0, 0, 1, 1], [], []>} : vector<8x8xbf16>, vector<8x8xbf16>, vector<8x8xf32> -> vector<8x8xf32>
    %130 = vector.extract_strided_slice %60 {offsets = [0, 24], sizes = [8, 8], strides = [1, 1]} : vector<8x96xf32> to vector<8x8xf32>
    %cst_42 = arith.constant 0.353553385 : f32
    %131 = vector.broadcast %cst_42 : f32 to vector<8x8xf32>
    %132 = arith.mulf %130, %131 : vector<8x8xf32>
    %133 = arith.truncf %132 : vector<8x8xf32> to vector<8x8xbf16>
    %134 = vector.extract_strided_slice %60 {offsets = [0, 56], sizes = [8, 8], strides = [1, 1]} : vector<8x96xf32> to vector<8x8xf32>
    %135 = arith.truncf %134 : vector<8x8xf32> to vector<8x8xbf16>
    %136 = vector.extract_strided_slice %60 {offsets = [0, 88], sizes = [8, 8], strides = [1, 1]} : vector<8x96xf32> to vector<8x8xf32>
    %137 = arith.truncf %136 : vector<8x8xf32> to vector<8x8xbf16>
    %cst_43 = arith.constant dense<0.000000e+00> : vector<8x8xf32>
    %138 = tpu.matmul %133, %135, %cst_43 {dimension_numbers = #tpu.dot_dimension_numbers<[1], [1], [0], [0], [0, 0, 1, 0], [], []>} : vector<8x8xbf16>, vector<8x8xbf16>, vector<8x8xf32> -> vector<8x8xf32>
    %cst_44 = arith.constant -3.40282347E+38 : f32
    %139 = vector.broadcast %cst_44 : f32 to vector<8x8xf32>
    %140 = arith.select %29, %139, %138 : vector<8x8xi1>, vector<8x8xf32>
    %cst_45 = arith.constant dense<0xFF800000> : vector<8xf32>
    %141 = vector.multi_reduction <maximumf>, %140, %cst_45 [1] : vector<8x8xf32> to vector<8xf32>
    %142 = vector.shape_cast %141 : vector<8xf32> to vector<8x1xf32>
    %143 = vector.broadcast %142 : vector<8x1xf32> to vector<8x8xf32>
    %144 = arith.subf %140, %143 : vector<8x8xf32>
    %145 = math.exp %144 : vector<8x8xf32>
    %cst_46 = arith.constant dense<0.000000e+00> : vector<8xf32>
    %146 = vector.multi_reduction <add>, %145, %cst_46 [1] : vector<8x8xf32> to vector<8xf32>
    %147 = vector.shape_cast %146 : vector<8xf32> to vector<8x1xf32>
    %148 = tpu.reciprocal %147 {approx = true} : vector<8x1xf32> -> vector<8x1xf32>
    %149 = vector.broadcast %148 : vector<8x1xf32> to vector<8x8xf32>
    %150 = arith.mulf %145, %149 : vector<8x8xf32>
    %151 = arith.truncf %150 : vector<8x8xf32> to vector<8x8xbf16>
    %cst_47 = arith.constant dense<0.000000e+00> : vector<8x8xf32>
    %152 = tpu.matmul %151, %137, %cst_47 {dimension_numbers = #tpu.dot_dimension_numbers<[1], [0], [0], [1], [0, 0, 1, 1], [], []>} : vector<8x8xbf16>, vector<8x8xbf16>, vector<8x8xf32> -> vector<8x8xf32>
    %153 = tpu.concatenate %83, %106, %129, %152 in 1 : vector<8x8xf32>, vector<8x8xf32>, vector<8x8xf32>, vector<8x8xf32> -> vector<8x32xf32>
    %154 = arith.truncf %153 : vector<8x32xf32> to vector<8x32xbf16>
    %c0_48 = arith.constant 0 : index
    %c0_49 = arith.constant 0 : index
    %c0_50 = arith.constant 0 : index
    %155 = vector.load %arg4[%c0_48, %c0_49, %c0_50] : memref<2x32x32xbf16, #tpu.memory_space<vmem>>, vector<1x32x32xbf16>
    %156 = vector.shape_cast %155 : vector<1x32x32xbf16> to vector<32x32xbf16>
    %cst_51 = arith.constant dense<0.000000e+00> : vector<8x32xf32>
    %157 = tpu.matmul %154, %156, %cst_51 {dimension_numbers = #tpu.dot_dimension_numbers<[1], [0], [0], [1], [0, 0, 1, 1], [], []>} : vector<8x32xbf16>, vector<32x32xbf16>, vector<8x32xf32> -> vector<8x32xf32>
    %c4_52 = arith.constant 4 : index
    %c0_53 = arith.constant 0 : index
    %158 = vector.load %arg7[%c4_52, %c0_53] : memref<18x128xf32, #tpu.memory_space<vmem>>, vector<1x32xf32>
    %159 = vector.broadcast %158 : vector<1x32xf32> to vector<8x32xf32>
    %160 = arith.addf %157, %159 : vector<8x32xf32>
    %161 = arith.addf %26, %160 : vector<8x32xf32>
    %c2_54 = arith.constant 2 : index
    %c0_55 = arith.constant 0 : index
    %162 = vector.load %arg7[%c2_54, %c0_55] : memref<18x128xf32, #tpu.memory_space<vmem>>, vector<1x32xf32>
    %c3_56 = arith.constant 3 : index
    %c0_57 = arith.constant 0 : index
    %163 = vector.load %arg7[%c3_56, %c0_57] : memref<18x128xf32, #tpu.memory_space<vmem>>, vector<1x32xf32>
    %cst_58 = arith.constant dense<0.000000e+00> : vector<8xf32>
    %164 = vector.multi_reduction <add>, %161, %cst_58 [1] : vector<8x32xf32> to vector<8xf32>
    %165 = vector.shape_cast %164 : vector<8xf32> to vector<8x1xf32>
    %cst_59 = arith.constant 3.200000e+01 : f32
    %166 = vector.broadcast %cst_59 : f32 to vector<8x1xf32>
    %167 = arith.divf %165, %166 : vector<8x1xf32>
    %168 = vector.broadcast %167 : vector<8x1xf32> to vector<8x32xf32>
    %169 = arith.subf %161, %168 : vector<8x32xf32>
    %170 = arith.mulf %169, %169 : vector<8x32xf32>
    %cst_60 = arith.constant dense<0.000000e+00> : vector<8xf32>
    %171 = vector.multi_reduction <add>, %170, %cst_60 [1] : vector<8x32xf32> to vector<8xf32>
    %172 = vector.shape_cast %171 : vector<8xf32> to vector<8x1xf32>
    %cst_61 = arith.constant 3.200000e+01 : f32
    %173 = vector.broadcast %cst_61 : f32 to vector<8x1xf32>
    %174 = arith.divf %172, %173 : vector<8x1xf32>
    %175 = vector.broadcast %167 : vector<8x1xf32> to vector<8x32xf32>
    %176 = arith.subf %161, %175 : vector<8x32xf32>
    %cst_62 = arith.constant 9.99999974E-6 : f32
    %177 = vector.broadcast %cst_62 : f32 to vector<8x1xf32>
    %178 = arith.addf %174, %177 : vector<8x1xf32>
    %179 = math.rsqrt %178 : vector<8x1xf32>
    %180 = vector.broadcast %179 : vector<8x1xf32> to vector<8x32xf32>
    %181 = arith.mulf %176, %180 : vector<8x32xf32>
    %182 = vector.broadcast %162 : vector<1x32xf32> to vector<8x32xf32>
    %183 = arith.mulf %181, %182 : vector<8x32xf32>
    %184 = vector.broadcast %163 : vector<1x32xf32> to vector<8x32xf32>
    %185 = arith.addf %183, %184 : vector<8x32xf32>
    %186 = arith.truncf %185 : vector<8x32xf32> to vector<8x32xbf16>
    %c0_63 = arith.constant 0 : index
    %c0_64 = arith.constant 0 : index
    %c0_65 = arith.constant 0 : index
    %187 = vector.load %arg5[%c0_63, %c0_64, %c0_65] : memref<2x32x128xbf16, #tpu.memory_space<vmem>>, vector<1x32x128xbf16>
    %188 = vector.shape_cast %187 : vector<1x32x128xbf16> to vector<32x128xbf16>
    %cst_66 = arith.constant dense<0.000000e+00> : vector<8x128xf32>
    %189 = tpu.matmul %186, %188, %cst_66 {dimension_numbers = #tpu.dot_dimension_numbers<[1], [0], [0], [1], [0, 0, 1, 1], [], []>} : vector<8x32xbf16>, vector<32x128xbf16>, vector<8x128xf32> -> vector<8x128xf32>
    %c6_67 = arith.constant 6 : index
    %c0_68 = arith.constant 0 : index
    %190 = vector.load %arg7[%c6_67, %c0_68] : memref<18x128xf32, #tpu.memory_space<vmem>>, vector<1x128xf32>
    %191 = vector.broadcast %190 : vector<1x128xf32> to vector<8x128xf32>
    %192 = arith.addf %189, %191 : vector<8x128xf32>
    %cst_69 = arith.constant 1.702000e+00 : f32
    %193 = vector.broadcast %cst_69 : f32 to vector<8x128xf32>
    %194 = arith.mulf %193, %192 : vector<8x128xf32>
    %195 = arith.negf %194 : vector<8x128xf32>
    %196 = math.exp %195 : vector<8x128xf32>
    %cst_70 = arith.constant 1.000000e+00 : f32
    %197 = vector.broadcast %cst_70 : f32 to vector<8x128xf32>
    %198 = arith.addf %197, %196 : vector<8x128xf32>
    %199 = arith.divf %197, %198 : vector<8x128xf32>
    %200 = arith.mulf %192, %199 : vector<8x128xf32>
    %201 = arith.truncf %200 : vector<8x128xf32> to vector<8x128xbf16>
    %c0_71 = arith.constant 0 : index
    %c0_72 = arith.constant 0 : index
    %c0_73 = arith.constant 0 : index
    %202 = vector.load %arg6[%c0_71, %c0_72, %c0_73] : memref<2x128x32xbf16, #tpu.memory_space<vmem>>, vector<1x128x32xbf16>
    %203 = vector.shape_cast %202 : vector<1x128x32xbf16> to vector<128x32xbf16>
    %cst_74 = arith.constant dense<0.000000e+00> : vector<8x32xf32>
    %204 = tpu.matmul %201, %203, %cst_74 {dimension_numbers = #tpu.dot_dimension_numbers<[1], [0], [0], [1], [0, 0, 1, 1], [], []>} : vector<8x128xbf16>, vector<128x32xbf16>, vector<8x32xf32> -> vector<8x32xf32>
    %c5_75 = arith.constant 5 : index
    %c0_76 = arith.constant 0 : index
    %205 = vector.load %arg7[%c5_75, %c0_76] : memref<18x128xf32, #tpu.memory_space<vmem>>, vector<1x32xf32>
    %206 = vector.broadcast %205 : vector<1x32xf32> to vector<8x32xf32>
    %207 = arith.addf %204, %206 : vector<8x32xf32>
    %208 = arith.addf %161, %207 : vector<8x32xf32>
    %c8 = arith.constant 8 : index
    %c0_77 = arith.constant 0 : index
    %209 = vector.load %arg7[%c8, %c0_77] : memref<18x128xf32, #tpu.memory_space<vmem>>, vector<1x32xf32>
    %c9 = arith.constant 9 : index
    %c0_78 = arith.constant 0 : index
    %210 = vector.load %arg7[%c9, %c0_78] : memref<18x128xf32, #tpu.memory_space<vmem>>, vector<1x32xf32>
    %cst_79 = arith.constant dense<0.000000e+00> : vector<8xf32>
    %211 = vector.multi_reduction <add>, %208, %cst_79 [1] : vector<8x32xf32> to vector<8xf32>
    %212 = vector.shape_cast %211 : vector<8xf32> to vector<8x1xf32>
    %cst_80 = arith.constant 3.200000e+01 : f32
    %213 = vector.broadcast %cst_80 : f32 to vector<8x1xf32>
    %214 = arith.divf %212, %213 : vector<8x1xf32>
    %215 = vector.broadcast %214 : vector<8x1xf32> to vector<8x32xf32>
    %216 = arith.subf %208, %215 : vector<8x32xf32>
    %217 = arith.mulf %216, %216 : vector<8x32xf32>
    %cst_81 = arith.constant dense<0.000000e+00> : vector<8xf32>
    %218 = vector.multi_reduction <add>, %217, %cst_81 [1] : vector<8x32xf32> to vector<8xf32>
    %219 = vector.shape_cast %218 : vector<8xf32> to vector<8x1xf32>
    %cst_82 = arith.constant 3.200000e+01 : f32
    %220 = vector.broadcast %cst_82 : f32 to vector<8x1xf32>
    %221 = arith.divf %219, %220 : vector<8x1xf32>
    %222 = vector.broadcast %214 : vector<8x1xf32> to vector<8x32xf32>
    %223 = arith.subf %208, %222 : vector<8x32xf32>
    %cst_83 = arith.constant 9.99999974E-6 : f32
    %224 = vector.broadcast %cst_83 : f32 to vector<8x1xf32>
    %225 = arith.addf %221, %224 : vector<8x1xf32>
    %226 = math.rsqrt %225 : vector<8x1xf32>
    %227 = vector.broadcast %226 : vector<8x1xf32> to vector<8x32xf32>
    %228 = arith.mulf %223, %227 : vector<8x32xf32>
    %229 = vector.broadcast %209 : vector<1x32xf32> to vector<8x32xf32>
    %230 = arith.mulf %228, %229 : vector<8x32xf32>
    %231 = vector.broadcast %210 : vector<1x32xf32> to vector<8x32xf32>
    %232 = arith.addf %230, %231 : vector<8x32xf32>
    %233 = arith.truncf %232 : vector<8x32xf32> to vector<8x32xbf16>
    %c1_84 = arith.constant 1 : index
    %c0_85 = arith.constant 0 : index
    %c0_86 = arith.constant 0 : index
    %234 = vector.load %arg3[%c1_84, %c0_85, %c0_86] : memref<2x32x96xbf16, #tpu.memory_space<vmem>>, vector<1x32x96xbf16>
    %235 = vector.shape_cast %234 : vector<1x32x96xbf16> to vector<32x96xbf16>
    %cst_87 = arith.constant dense<0.000000e+00> : vector<8x96xf32>
    %236 = tpu.matmul %233, %235, %cst_87 {dimension_numbers = #tpu.dot_dimension_numbers<[1], [0], [0], [1], [0, 0, 1, 1], [], []>} : vector<8x32xbf16>, vector<32x96xbf16>, vector<8x96xf32> -> vector<8x96xf32>
    %c15 = arith.constant 15 : index
    %c0_88 = arith.constant 0 : index
    %237 = vector.load %arg7[%c15, %c0_88] : memref<18x128xf32, #tpu.memory_space<vmem>>, vector<1x96xf32>
    %238 = vector.broadcast %237 : vector<1x96xf32> to vector<8x96xf32>
    %239 = arith.addf %236, %238 : vector<8x96xf32>
    %240 = vector.extract_strided_slice %239 {offsets = [0, 0], sizes = [8, 8], strides = [1, 1]} : vector<8x96xf32> to vector<8x8xf32>
    %cst_89 = arith.constant 0.353553385 : f32
    %241 = vector.broadcast %cst_89 : f32 to vector<8x8xf32>
    %242 = arith.mulf %240, %241 : vector<8x8xf32>
    %243 = arith.truncf %242 : vector<8x8xf32> to vector<8x8xbf16>
    %244 = vector.extract_strided_slice %239 {offsets = [0, 32], sizes = [8, 8], strides = [1, 1]} : vector<8x96xf32> to vector<8x8xf32>
    %245 = arith.truncf %244 : vector<8x8xf32> to vector<8x8xbf16>
    %246 = vector.extract_strided_slice %239 {offsets = [0, 64], sizes = [8, 8], strides = [1, 1]} : vector<8x96xf32> to vector<8x8xf32>
    %247 = arith.truncf %246 : vector<8x8xf32> to vector<8x8xbf16>
    %cst_90 = arith.constant dense<0.000000e+00> : vector<8x8xf32>
    %248 = tpu.matmul %243, %245, %cst_90 {dimension_numbers = #tpu.dot_dimension_numbers<[1], [1], [0], [0], [0, 0, 1, 0], [], []>} : vector<8x8xbf16>, vector<8x8xbf16>, vector<8x8xf32> -> vector<8x8xf32>
    %cst_91 = arith.constant -3.40282347E+38 : f32
    %249 = vector.broadcast %cst_91 : f32 to vector<8x8xf32>
    %250 = arith.select %29, %249, %248 : vector<8x8xi1>, vector<8x8xf32>
    %cst_92 = arith.constant dense<0xFF800000> : vector<8xf32>
    %251 = vector.multi_reduction <maximumf>, %250, %cst_92 [1] : vector<8x8xf32> to vector<8xf32>
    %252 = vector.shape_cast %251 : vector<8xf32> to vector<8x1xf32>
    %253 = vector.broadcast %252 : vector<8x1xf32> to vector<8x8xf32>
    %254 = arith.subf %250, %253 : vector<8x8xf32>
    %255 = math.exp %254 : vector<8x8xf32>
    %cst_93 = arith.constant dense<0.000000e+00> : vector<8xf32>
    %256 = vector.multi_reduction <add>, %255, %cst_93 [1] : vector<8x8xf32> to vector<8xf32>
    %257 = vector.shape_cast %256 : vector<8xf32> to vector<8x1xf32>
    %258 = tpu.reciprocal %257 {approx = true} : vector<8x1xf32> -> vector<8x1xf32>
    %259 = vector.broadcast %258 : vector<8x1xf32> to vector<8x8xf32>
    %260 = arith.mulf %255, %259 : vector<8x8xf32>
    %261 = arith.truncf %260 : vector<8x8xf32> to vector<8x8xbf16>
    %cst_94 = arith.constant dense<0.000000e+00> : vector<8x8xf32>
    %262 = tpu.matmul %261, %247, %cst_94 {dimension_numbers = #tpu.dot_dimension_numbers<[1], [0], [0], [1], [0, 0, 1, 1], [], []>} : vector<8x8xbf16>, vector<8x8xbf16>, vector<8x8xf32> -> vector<8x8xf32>
    %263 = vector.extract_strided_slice %239 {offsets = [0, 8], sizes = [8, 8], strides = [1, 1]} : vector<8x96xf32> to vector<8x8xf32>
    %cst_95 = arith.constant 0.353553385 : f32
    %264 = vector.broadcast %cst_95 : f32 to vector<8x8xf32>
    %265 = arith.mulf %263, %264 : vector<8x8xf32>
    %266 = arith.truncf %265 : vector<8x8xf32> to vector<8x8xbf16>
    %267 = vector.extract_strided_slice %239 {offsets = [0, 40], sizes = [8, 8], strides = [1, 1]} : vector<8x96xf32> to vector<8x8xf32>
    %268 = arith.truncf %267 : vector<8x8xf32> to vector<8x8xbf16>
    %269 = vector.extract_strided_slice %239 {offsets = [0, 72], sizes = [8, 8], strides = [1, 1]} : vector<8x96xf32> to vector<8x8xf32>
    %270 = arith.truncf %269 : vector<8x8xf32> to vector<8x8xbf16>
    %cst_96 = arith.constant dense<0.000000e+00> : vector<8x8xf32>
    %271 = tpu.matmul %266, %268, %cst_96 {dimension_numbers = #tpu.dot_dimension_numbers<[1], [1], [0], [0], [0, 0, 1, 0], [], []>} : vector<8x8xbf16>, vector<8x8xbf16>, vector<8x8xf32> -> vector<8x8xf32>
    %cst_97 = arith.constant -3.40282347E+38 : f32
    %272 = vector.broadcast %cst_97 : f32 to vector<8x8xf32>
    %273 = arith.select %29, %272, %271 : vector<8x8xi1>, vector<8x8xf32>
    %cst_98 = arith.constant dense<0xFF800000> : vector<8xf32>
    %274 = vector.multi_reduction <maximumf>, %273, %cst_98 [1] : vector<8x8xf32> to vector<8xf32>
    %275 = vector.shape_cast %274 : vector<8xf32> to vector<8x1xf32>
    %276 = vector.broadcast %275 : vector<8x1xf32> to vector<8x8xf32>
    %277 = arith.subf %273, %276 : vector<8x8xf32>
    %278 = math.exp %277 : vector<8x8xf32>
    %cst_99 = arith.constant dense<0.000000e+00> : vector<8xf32>
    %279 = vector.multi_reduction <add>, %278, %cst_99 [1] : vector<8x8xf32> to vector<8xf32>
    %280 = vector.shape_cast %279 : vector<8xf32> to vector<8x1xf32>
    %281 = tpu.reciprocal %280 {approx = true} : vector<8x1xf32> -> vector<8x1xf32>
    %282 = vector.broadcast %281 : vector<8x1xf32> to vector<8x8xf32>
    %283 = arith.mulf %278, %282 : vector<8x8xf32>
    %284 = arith.truncf %283 : vector<8x8xf32> to vector<8x8xbf16>
    %cst_100 = arith.constant dense<0.000000e+00> : vector<8x8xf32>
    %285 = tpu.matmul %284, %270, %cst_100 {dimension_numbers = #tpu.dot_dimension_numbers<[1], [0], [0], [1], [0, 0, 1, 1], [], []>} : vector<8x8xbf16>, vector<8x8xbf16>, vector<8x8xf32> -> vector<8x8xf32>
    %286 = vector.extract_strided_slice %239 {offsets = [0, 16], sizes = [8, 8], strides = [1, 1]} : vector<8x96xf32> to vector<8x8xf32>
    %cst_101 = arith.constant 0.353553385 : f32
    %287 = vector.broadcast %cst_101 : f32 to vector<8x8xf32>
    %288 = arith.mulf %286, %287 : vector<8x8xf32>
    %289 = arith.truncf %288 : vector<8x8xf32> to vector<8x8xbf16>
    %290 = vector.extract_strided_slice %239 {offsets = [0, 48], sizes = [8, 8], strides = [1, 1]} : vector<8x96xf32> to vector<8x8xf32>
    %291 = arith.truncf %290 : vector<8x8xf32> to vector<8x8xbf16>
    %292 = vector.extract_strided_slice %239 {offsets = [0, 80], sizes = [8, 8], strides = [1, 1]} : vector<8x96xf32> to vector<8x8xf32>
    %293 = arith.truncf %292 : vector<8x8xf32> to vector<8x8xbf16>
    %cst_102 = arith.constant dense<0.000000e+00> : vector<8x8xf32>
    %294 = tpu.matmul %289, %291, %cst_102 {dimension_numbers = #tpu.dot_dimension_numbers<[1], [1], [0], [0], [0, 0, 1, 0], [], []>} : vector<8x8xbf16>, vector<8x8xbf16>, vector<8x8xf32> -> vector<8x8xf32>
    %cst_103 = arith.constant -3.40282347E+38 : f32
    %295 = vector.broadcast %cst_103 : f32 to vector<8x8xf32>
    %296 = arith.select %29, %295, %294 : vector<8x8xi1>, vector<8x8xf32>
    %cst_104 = arith.constant dense<0xFF800000> : vector<8xf32>
    %297 = vector.multi_reduction <maximumf>, %296, %cst_104 [1] : vector<8x8xf32> to vector<8xf32>
    %298 = vector.shape_cast %297 : vector<8xf32> to vector<8x1xf32>
    %299 = vector.broadcast %298 : vector<8x1xf32> to vector<8x8xf32>
    %300 = arith.subf %296, %299 : vector<8x8xf32>
    %301 = math.exp %300 : vector<8x8xf32>
    %cst_105 = arith.constant dense<0.000000e+00> : vector<8xf32>
    %302 = vector.multi_reduction <add>, %301, %cst_105 [1] : vector<8x8xf32> to vector<8xf32>
    %303 = vector.shape_cast %302 : vector<8xf32> to vector<8x1xf32>
    %304 = tpu.reciprocal %303 {approx = true} : vector<8x1xf32> -> vector<8x1xf32>
    %305 = vector.broadcast %304 : vector<8x1xf32> to vector<8x8xf32>
    %306 = arith.mulf %301, %305 : vector<8x8xf32>
    %307 = arith.truncf %306 : vector<8x8xf32> to vector<8x8xbf16>
    %cst_106 = arith.constant dense<0.000000e+00> : vector<8x8xf32>
    %308 = tpu.matmul %307, %293, %cst_106 {dimension_numbers = #tpu.dot_dimension_numbers<[1], [0], [0], [1], [0, 0, 1, 1], [], []>} : vector<8x8xbf16>, vector<8x8xbf16>, vector<8x8xf32> -> vector<8x8xf32>
    %309 = vector.extract_strided_slice %239 {offsets = [0, 24], sizes = [8, 8], strides = [1, 1]} : vector<8x96xf32> to vector<8x8xf32>
    %cst_107 = arith.constant 0.353553385 : f32
    %310 = vector.broadcast %cst_107 : f32 to vector<8x8xf32>
    %311 = arith.mulf %309, %310 : vector<8x8xf32>
    %312 = arith.truncf %311 : vector<8x8xf32> to vector<8x8xbf16>
    %313 = vector.extract_strided_slice %239 {offsets = [0, 56], sizes = [8, 8], strides = [1, 1]} : vector<8x96xf32> to vector<8x8xf32>
    %314 = arith.truncf %313 : vector<8x8xf32> to vector<8x8xbf16>
    %315 = vector.extract_strided_slice %239 {offsets = [0, 88], sizes = [8, 8], strides = [1, 1]} : vector<8x96xf32> to vector<8x8xf32>
    %316 = arith.truncf %315 : vector<8x8xf32> to vector<8x8xbf16>
    %cst_108 = arith.constant dense<0.000000e+00> : vector<8x8xf32>
    %317 = tpu.matmul %312, %314, %cst_108 {dimension_numbers = #tpu.dot_dimension_numbers<[1], [1], [0], [0], [0, 0, 1, 0], [], []>} : vector<8x8xbf16>, vector<8x8xbf16>, vector<8x8xf32> -> vector<8x8xf32>
    %cst_109 = arith.constant -3.40282347E+38 : f32
    %318 = vector.broadcast %cst_109 : f32 to vector<8x8xf32>
    %319 = arith.select %29, %318, %317 : vector<8x8xi1>, vector<8x8xf32>
    %cst_110 = arith.constant dense<0xFF800000> : vector<8xf32>
    %320 = vector.multi_reduction <maximumf>, %319, %cst_110 [1] : vector<8x8xf32> to vector<8xf32>
    %321 = vector.shape_cast %320 : vector<8xf32> to vector<8x1xf32>
    %322 = vector.broadcast %321 : vector<8x1xf32> to vector<8x8xf32>
    %323 = arith.subf %319, %322 : vector<8x8xf32>
    %324 = math.exp %323 : vector<8x8xf32>
    %cst_111 = arith.constant dense<0.000000e+00> : vector<8xf32>
    %325 = vector.multi_reduction <add>, %324, %cst_111 [1] : vector<8x8xf32> to vector<8xf32>
    %326 = vector.shape_cast %325 : vector<8xf32> to vector<8x1xf32>
    %327 = tpu.reciprocal %326 {approx = true} : vector<8x1xf32> -> vector<8x1xf32>
    %328 = vector.broadcast %327 : vector<8x1xf32> to vector<8x8xf32>
    %329 = arith.mulf %324, %328 : vector<8x8xf32>
    %330 = arith.truncf %329 : vector<8x8xf32> to vector<8x8xbf16>
    %cst_112 = arith.constant dense<0.000000e+00> : vector<8x8xf32>
    %331 = tpu.matmul %330, %316, %cst_112 {dimension_numbers = #tpu.dot_dimension_numbers<[1], [0], [0], [1], [0, 0, 1, 1], [], []>} : vector<8x8xbf16>, vector<8x8xbf16>, vector<8x8xf32> -> vector<8x8xf32>
    %332 = tpu.concatenate %262, %285, %308, %331 in 1 : vector<8x8xf32>, vector<8x8xf32>, vector<8x8xf32>, vector<8x8xf32> -> vector<8x32xf32>
    %333 = arith.truncf %332 : vector<8x32xf32> to vector<8x32xbf16>
    %c1_113 = arith.constant 1 : index
    %c0_114 = arith.constant 0 : index
    %c0_115 = arith.constant 0 : index
    %334 = vector.load %arg4[%c1_113, %c0_114, %c0_115] : memref<2x32x32xbf16, #tpu.memory_space<vmem>>, vector<1x32x32xbf16>
    %335 = vector.shape_cast %334 : vector<1x32x32xbf16> to vector<32x32xbf16>
    %cst_116 = arith.constant dense<0.000000e+00> : vector<8x32xf32>
    %336 = tpu.matmul %333, %335, %cst_116 {dimension_numbers = #tpu.dot_dimension_numbers<[1], [0], [0], [1], [0, 0, 1, 1], [], []>} : vector<8x32xbf16>, vector<32x32xbf16>, vector<8x32xf32> -> vector<8x32xf32>
    %c12 = arith.constant 12 : index
    %c0_117 = arith.constant 0 : index
    %337 = vector.load %arg7[%c12, %c0_117] : memref<18x128xf32, #tpu.memory_space<vmem>>, vector<1x32xf32>
    %338 = vector.broadcast %337 : vector<1x32xf32> to vector<8x32xf32>
    %339 = arith.addf %336, %338 : vector<8x32xf32>
    %340 = arith.addf %208, %339 : vector<8x32xf32>
    %c10 = arith.constant 10 : index
    %c0_118 = arith.constant 0 : index
    %341 = vector.load %arg7[%c10, %c0_118] : memref<18x128xf32, #tpu.memory_space<vmem>>, vector<1x32xf32>
    %c11 = arith.constant 11 : index
    %c0_119 = arith.constant 0 : index
    %342 = vector.load %arg7[%c11, %c0_119] : memref<18x128xf32, #tpu.memory_space<vmem>>, vector<1x32xf32>
    %cst_120 = arith.constant dense<0.000000e+00> : vector<8xf32>
    %343 = vector.multi_reduction <add>, %340, %cst_120 [1] : vector<8x32xf32> to vector<8xf32>
    %344 = vector.shape_cast %343 : vector<8xf32> to vector<8x1xf32>
    %cst_121 = arith.constant 3.200000e+01 : f32
    %345 = vector.broadcast %cst_121 : f32 to vector<8x1xf32>
    %346 = arith.divf %344, %345 : vector<8x1xf32>
    %347 = vector.broadcast %346 : vector<8x1xf32> to vector<8x32xf32>
    %348 = arith.subf %340, %347 : vector<8x32xf32>
    %349 = arith.mulf %348, %348 : vector<8x32xf32>
    %cst_122 = arith.constant dense<0.000000e+00> : vector<8xf32>
    %350 = vector.multi_reduction <add>, %349, %cst_122 [1] : vector<8x32xf32> to vector<8xf32>
    %351 = vector.shape_cast %350 : vector<8xf32> to vector<8x1xf32>
    %cst_123 = arith.constant 3.200000e+01 : f32
    %352 = vector.broadcast %cst_123 : f32 to vector<8x1xf32>
    %353 = arith.divf %351, %352 : vector<8x1xf32>
    %354 = vector.broadcast %346 : vector<8x1xf32> to vector<8x32xf32>
    %355 = arith.subf %340, %354 : vector<8x32xf32>
    %cst_124 = arith.constant 9.99999974E-6 : f32
    %356 = vector.broadcast %cst_124 : f32 to vector<8x1xf32>
    %357 = arith.addf %353, %356 : vector<8x1xf32>
    %358 = math.rsqrt %357 : vector<8x1xf32>
    %359 = vector.broadcast %358 : vector<8x1xf32> to vector<8x32xf32>
    %360 = arith.mulf %355, %359 : vector<8x32xf32>
    %361 = vector.broadcast %341 : vector<1x32xf32> to vector<8x32xf32>
    %362 = arith.mulf %360, %361 : vector<8x32xf32>
    %363 = vector.broadcast %342 : vector<1x32xf32> to vector<8x32xf32>
    %364 = arith.addf %362, %363 : vector<8x32xf32>
    %365 = arith.truncf %364 : vector<8x32xf32> to vector<8x32xbf16>
    %c1_125 = arith.constant 1 : index
    %c0_126 = arith.constant 0 : index
    %c0_127 = arith.constant 0 : index
    %366 = vector.load %arg5[%c1_125, %c0_126, %c0_127] : memref<2x32x128xbf16, #tpu.memory_space<vmem>>, vector<1x32x128xbf16>
    %367 = vector.shape_cast %366 : vector<1x32x128xbf16> to vector<32x128xbf16>
    %cst_128 = arith.constant dense<0.000000e+00> : vector<8x128xf32>
    %368 = tpu.matmul %365, %367, %cst_128 {dimension_numbers = #tpu.dot_dimension_numbers<[1], [0], [0], [1], [0, 0, 1, 1], [], []>} : vector<8x32xbf16>, vector<32x128xbf16>, vector<8x128xf32> -> vector<8x128xf32>
    %c14 = arith.constant 14 : index
    %c0_129 = arith.constant 0 : index
    %369 = vector.load %arg7[%c14, %c0_129] : memref<18x128xf32, #tpu.memory_space<vmem>>, vector<1x128xf32>
    %370 = vector.broadcast %369 : vector<1x128xf32> to vector<8x128xf32>
    %371 = arith.addf %368, %370 : vector<8x128xf32>
    %cst_130 = arith.constant 1.702000e+00 : f32
    %372 = vector.broadcast %cst_130 : f32 to vector<8x128xf32>
    %373 = arith.mulf %372, %371 : vector<8x128xf32>
    %374 = arith.negf %373 : vector<8x128xf32>
    %375 = math.exp %374 : vector<8x128xf32>
    %cst_131 = arith.constant 1.000000e+00 : f32
    %376 = vector.broadcast %cst_131 : f32 to vector<8x128xf32>
    %377 = arith.addf %376, %375 : vector<8x128xf32>
    %378 = arith.divf %376, %377 : vector<8x128xf32>
    %379 = arith.mulf %371, %378 : vector<8x128xf32>
    %380 = arith.truncf %379 : vector<8x128xf32> to vector<8x128xbf16>
    %c1_132 = arith.constant 1 : index
    %c0_133 = arith.constant 0 : index
    %c0_134 = arith.constant 0 : index
    %381 = vector.load %arg6[%c1_132, %c0_133, %c0_134] : memref<2x128x32xbf16, #tpu.memory_space<vmem>>, vector<1x128x32xbf16>
    %382 = vector.shape_cast %381 : vector<1x128x32xbf16> to vector<128x32xbf16>
    %cst_135 = arith.constant dense<0.000000e+00> : vector<8x32xf32>
    %383 = tpu.matmul %380, %382, %cst_135 {dimension_numbers = #tpu.dot_dimension_numbers<[1], [0], [0], [1], [0, 0, 1, 1], [], []>} : vector<8x128xbf16>, vector<128x32xbf16>, vector<8x32xf32> -> vector<8x32xf32>
    %c13 = arith.constant 13 : index
    %c0_136 = arith.constant 0 : index
    %384 = vector.load %arg7[%c13, %c0_136] : memref<18x128xf32, #tpu.memory_space<vmem>>, vector<1x32xf32>
    %385 = vector.broadcast %384 : vector<1x32xf32> to vector<8x32xf32>
    %386 = arith.addf %383, %385 : vector<8x32xf32>
    %387 = arith.addf %340, %386 : vector<8x32xf32>
    %c16 = arith.constant 16 : index
    %c0_137 = arith.constant 0 : index
    %388 = vector.load %arg7[%c16, %c0_137] : memref<18x128xf32, #tpu.memory_space<vmem>>, vector<1x32xf32>
    %c17 = arith.constant 17 : index
    %c0_138 = arith.constant 0 : index
    %389 = vector.load %arg7[%c17, %c0_138] : memref<18x128xf32, #tpu.memory_space<vmem>>, vector<1x32xf32>
    %cst_139 = arith.constant dense<0.000000e+00> : vector<8xf32>
    %390 = vector.multi_reduction <add>, %387, %cst_139 [1] : vector<8x32xf32> to vector<8xf32>
    %391 = vector.shape_cast %390 : vector<8xf32> to vector<8x1xf32>
    %cst_140 = arith.constant 3.200000e+01 : f32
    %392 = vector.broadcast %cst_140 : f32 to vector<8x1xf32>
    %393 = arith.divf %391, %392 : vector<8x1xf32>
    %394 = vector.broadcast %393 : vector<8x1xf32> to vector<8x32xf32>
    %395 = arith.subf %387, %394 : vector<8x32xf32>
    %396 = arith.mulf %395, %395 : vector<8x32xf32>
    %cst_141 = arith.constant dense<0.000000e+00> : vector<8xf32>
    %397 = vector.multi_reduction <add>, %396, %cst_141 [1] : vector<8x32xf32> to vector<8xf32>
    %398 = vector.shape_cast %397 : vector<8xf32> to vector<8x1xf32>
    %cst_142 = arith.constant 3.200000e+01 : f32
    %399 = vector.broadcast %cst_142 : f32 to vector<8x1xf32>
    %400 = arith.divf %398, %399 : vector<8x1xf32>
    %401 = vector.broadcast %393 : vector<8x1xf32> to vector<8x32xf32>
    %402 = arith.subf %387, %401 : vector<8x32xf32>
    %cst_143 = arith.constant 9.99999974E-6 : f32
    %403 = vector.broadcast %cst_143 : f32 to vector<8x1xf32>
    %404 = arith.addf %400, %403 : vector<8x1xf32>
    %405 = math.rsqrt %404 : vector<8x1xf32>
    %406 = vector.broadcast %405 : vector<8x1xf32> to vector<8x32xf32>
    %407 = arith.mulf %402, %406 : vector<8x32xf32>
    %408 = vector.broadcast %388 : vector<1x32xf32> to vector<8x32xf32>
    %409 = arith.mulf %407, %408 : vector<8x32xf32>
    %410 = vector.broadcast %389 : vector<1x32xf32> to vector<8x32xf32>
    %411 = arith.addf %409, %410 : vector<8x32xf32>
    %c0_144 = arith.constant 0 : index
    %c0_145 = arith.constant 0 : index
    %412 = vector.load %arg8[%c0_144, %c0_145] : memref<8x32xf32, #tpu.memory_space<vmem>>, vector<8x32xf32>
    tpu.vector_store %arg8[%c0_144, %c0_145], %411 {strides = array<i32>} : memref<8x32xf32, #tpu.memory_space<vmem>>, vector<8x32xf32>,
    %c0_146 = arith.constant 0 : index
    %413 = memref.load %arg0[%c0_146] : memref<8xi32, #tpu.memory_space<smem>>
    %c1_147 = arith.constant 1 : index
    %414 = memref.load %arg0[%c1_147] : memref<8xi32, #tpu.memory_space<smem>>
    %415 = arith.cmpi sgt, %414, %413 : i32
    %c1_i32 = arith.constant 1 : i32
    %c0_i32 = arith.constant 0 : i32
    %416 = arith.select %415, %c1_i32, %c0_i32 : i32
    %417 = arith.select %415, %414, %413 : i32
    %c2_148 = arith.constant 2 : index
    %418 = memref.load %arg0[%c2_148] : memref<8xi32, #tpu.memory_space<smem>>
    %419 = arith.cmpi sgt, %418, %417 : i32
    %c2_i32 = arith.constant 2 : i32
    %420 = arith.select %419, %c2_i32, %416 : i32
    %421 = arith.select %419, %418, %417 : i32
    %c3_149 = arith.constant 3 : index
    %422 = memref.load %arg0[%c3_149] : memref<8xi32, #tpu.memory_space<smem>>
    %423 = arith.cmpi sgt, %422, %421 : i32
    %c3_i32 = arith.constant 3 : i32
    %424 = arith.select %423, %c3_i32, %420 : i32
    %425 = arith.select %423, %422, %421 : i32
    %c4_150 = arith.constant 4 : index
    %426 = memref.load %arg0[%c4_150] : memref<8xi32, #tpu.memory_space<smem>>
    %427 = arith.cmpi sgt, %426, %425 : i32
    %c4_i32 = arith.constant 4 : i32
    %428 = arith.select %427, %c4_i32, %424 : i32
    %429 = arith.select %427, %426, %425 : i32
    %c5_151 = arith.constant 5 : index
    %430 = memref.load %arg0[%c5_151] : memref<8xi32, #tpu.memory_space<smem>>
    %431 = arith.cmpi sgt, %430, %429 : i32
    %c5_i32 = arith.constant 5 : i32
    %432 = arith.select %431, %c5_i32, %428 : i32
    %433 = arith.select %431, %430, %429 : i32
    %c6_152 = arith.constant 6 : index
    %434 = memref.load %arg0[%c6_152] : memref<8xi32, #tpu.memory_space<smem>>
    %435 = arith.cmpi sgt, %434, %433 : i32
    %c6_i32 = arith.constant 6 : i32
    %436 = arith.select %435, %c6_i32, %432 : i32
    %437 = arith.select %435, %434, %433 : i32
    %c7_153 = arith.constant 7 : index
    %438 = memref.load %arg0[%c7_153] : memref<8xi32, #tpu.memory_space<smem>>
    %439 = arith.cmpi sgt, %438, %437 : i32
    %c7_i32 = arith.constant 7 : i32
    %440 = arith.select %439, %c7_i32, %436 : i32
    %441 = tpu.iota {dimensions = array<i32: 0>} : vector<8x1xi32>
    %442 = vector.broadcast %440 : i32 to vector<8x1xi32>
    %443 = arith.cmpi eq, %441, %442 : vector<8x1xi32>
    %cst_154 = arith.constant 0.000000e+00 : f32
    %444 = vector.shape_cast %443 : vector<8x1xi1> to vector<8x1xi1>
    %445 = vector.broadcast %444 : vector<8x1xi1> to vector<8x32xi1>
    %446 = vector.broadcast %cst_154 : f32 to vector<8x32xf32>
    %447 = arith.select %445, %411, %446 : vector<8x32xi1>, vector<8x32xf32>
    %cst_155 = arith.constant dense<0.000000e+00> : vector<32xf32>
    %448 = vector.multi_reduction <add>, %447, %cst_155 [0] : vector<8x32xf32> to vector<32xf32>
    %449 = vector.shape_cast %448 : vector<32xf32> to vector<1x32xf32>
    %c0_156 = arith.constant 0 : index
    %c0_157 = arith.constant 0 : index
    %450 = vector.load %arg9[%c0_156, %c0_157] : memref<1x32xf32, #tpu.memory_space<vmem>>, vector<1x32xf32>
    tpu.vector_store %arg9[%c0_156, %c0_157], %449 {strides = array<i32>} : memref<1x32xf32, #tpu.memory_space<vmem>>, vector<1x32xf32>,
    return
  }
}

</mosaic_0001>

<bundles_post_ra>
// kernel: clip_forward.1
= control target key start
LH: loop header
LB: loop body
LE: loop exit
PB: predicated region body
PF: predicated region fallthrough
CT: control target
= control target key end

     0   :  { %15 = vsyncpa [#allocation4], 0  ;;  %s2934_s0 = inlined_call_operand.vmem [shape: s32[8], index: 0, kind: input, shape index: {}]   ;;  %s2935_s1 = inlined_call_operand.vmem [shape: f32[64,32], index: 1, kind: input, shape index: {}]   ;;  %s2936_s2 = inlined_call_operand.vmem [shape: f32[8,32], index: 2, kind: input, shape index: {}]   ;;  %s2937_s3 = inlined_call_operand.vmem [shape: bf16[2,32,96], index: 3, kind: input, shape index: {}]   ;;  %s2938_s4 = inlined_call_operand.vmem [shape: bf16[2,32,32], index: 4, kind: input, shape index: {}]   ;;  %s2939_s5 = inlined_call_operand.vmem [shape: bf16[2,32,128], index: 5, kind: input, shape index: {}]   ;;  %s2940_s6 = inlined_call_operand.vmem [shape: bf16[2,128,32], index: 6, kind: input, shape index: {}]   ;;  %s2941_s7 = inlined_call_operand.vmem [shape: f32[18,128], index: 7, kind: input, shape index: {}]   ;;  %s2942_s8 = inlined_call_operand.hbm [shape: f32[8,32], index: 8, kind: output, shape index: {0}]   ;;  %s2943_s9 = inlined_call_operand.hbm [shape: f32[1,32], index: 9, kind: output, shape index: {1}]  }
   0x1   :  { %16 = vsyncpa [#allocation3], 0 }
   0x2   :  { %17 = vsyncpa [#allocation7], 0  ;;  %s24_s11 = sshll.u32 %s2934_s0, 4  ;;  %s25_s11 = int_to_ptr.vmem [resolvable:$true] %s24_s11 }
   0x3   :  { %s2342_s12 = scalar_lea.vmem %s25_s11, 16  ;;  %p2347_p1 = scmp.lt.s32.totalorder %s25_s11, %s25_s11 }
   0x4   :  { %p2343_p0 = scmp.ne.s32.totalorder %s25_s11, %s2342_s12  ;;  %p2348_p2 = scmp.lt.s32.totalorder %s2342_s12, %s2342_s12 }
   0x6   :  { %p2349_p3 = por %p2348_p2, %p2347_p1 }
   0x8   :  { %p2350_p4 = pnand %p2349_p3, %p2343_p0 }
   0xa   :  { %2353 = shalt.err (!%p2350_p4)
}
   0xb   :  { %s2404_s13 = smov [#allocation2]  }
   0xc   :  { %27 = dma.vmem_to_smem %s25_s11, 16, %s2404_s13, [#allocation4]  }
   0xd   :  { %2398 = dma.done.wait [#allocation4], 16  }
   0xe   :  { %2399 = vsyncadd [#allocation4], 4294967280 }
   0xf   :  { %45 = sfence }
  0x10   :  { %s47_s14 = sld [smem:[#allocation2]]  ;;  %s1881_s15 = sld [smem:[#allocation2 + $0x1]]  ;;  %vm92_vm0 = vcmask 1040384   ;;  %vm94_vm1 = vcmask 1041408   ;;  %vm96_vm2 = vcmask 1042432   ;;  %vm98_vm3 = vcmask 1043456  }
  0x11   :  { %s1882_s16 = sld [smem:[#allocation2 + $0x2]]  ;;  %s1883_s17 = sld [smem:[#allocation2 + $0x3]]  ;;  %vm100_vm4 = vcmask 1044480   ;;  %vm102_vm5 = vcmask 1045504   ;;  %vm104_vm6 = vcmask 1046528   ;;  %vm115_vm7 = vcmask 261120  }
  0x12   :  { %s1884_s18 = sld [smem:[#allocation2 + $0x4]]  ;;  %s1885_s19 = sld [smem:[#allocation2 + $0x5]]  ;;  %v106_v18 = vld [vmem:[%s2936_s2] sm:$0xff]  ;;  %v2405_v31 = vmov 0.0   ;;  %vm2406_vm8 = vmmov 0   ;;  %v2265_v32 = vld [vmem:[%s2937_s3 + $0x8] sm:$0xff]   ;;  %v108_v56 = vlaneseq }
  0x13   :  { %s1886_s0 = sld [smem:[#allocation2 + $0x6]]  ;;  %s1887_s20 = sld [smem:[#allocation2 + $0x7]]  ;;  %v2264_v30 = vld [vmem:[%s2937_s3] sm:$0xff]   ;;  %2061 = vmatprep.subr.bf16.mxu1 %v2405_v31  ;;  %2065 = vmatprep.mubr.msk.bf16.mxu1 %vm2406_vm8, %v2405_v31  ;;  %vm211_vm9 = vcmask 64512   ;;  %vm666_vm11 = vcmask 130048   ;;  %vm668_vm12 = vcmask 195584  }
  0x14   :  { %2062 = vmatpush3.bf16.msra.mxu1 %v2264_v30  ;;  %2087 = vmatprep.subr.bf16.mxu0 %v2405_v31  ;;  %v1888_v37 = vld [vmem:[%s2941_s7] ss:$0 sm:$0xff]  ;;  %v1889_v39 = vld [vmem:[%s2941_s7 + $0x1] ss:$0 sm:$0xff]  ;;  %v1890_v43 = vld [vmem:[%s2941_s7 + $0x7] ss:$0 sm:$0xff] }
  0x15   :  { %2063 = vmatprep.subr.bf16.mxu1 %v2405_v31  ;;  %2089 = vmatprep.mubr.msk.bf16.mxu0 %vm2406_vm8, %v2405_v31  ;;  %s2407_s12 = smov 64   ;;  %s2408_s13 = smov 96   ;;  %v2555_v57 = vshrl.u32 %v108_v56, 7  ;;  %v111_v58 = vand.u32 127, %v108_v56 }
  0x16   :  { %s48_s23 = scalar_lea.vmem %s2935_s1, %s47_s14  ;;  %s51_s26 = scalar_lea.vmem %s2935_s1, %s1881_s15 }
  0x17   :  { %v49_v0 = vld [vmem:[%s48_s23] sm:$0x1]  ;;  %s54_s29 = scalar_lea.vmem %s2935_s1, %s1882_s16  ;;  %s57_s11 = scalar_lea.vmem %s2935_s1, %s1883_s17  ;;  %vm2558_vm10 = vcmp.gt.s32.totalorder %v111_v58, %v2555_v57 }
  0x18   :  { %v52_v1 = vld [vmem:[%s51_s26] sm:$0x1]  ;;  %s60_s14 = scalar_lea.vmem %s2935_s1, %s1884_s18  ;;  %s63_s15 = scalar_lea.vmem %s2935_s1, %s1885_s19  ;;  %2064 = vmatpush3.bf16.msra.mxu1 %v2265_v32 }
  0x19   :  { %v55_v2 = vld [vmem:[%s54_s29] sm:$0x1]  ;;  %v72_v4 = vrot.slane %v52_v1, 7  ;;  %s66_s24 = scalar_lea.vmem %s2935_s1, %s1886_s0  ;;  %s69_s26 = scalar_lea.vmem %s2935_s1, %s1887_s20  ;;  %2069 = vmatprep.subr.bf16.mxu1 %v2405_v31 }
  0x1a   :  { %v58_v3 = vld [vmem:[%s57_s11] sm:$0x1]  ;;  %v75_v7 = vrot.slane %v55_v2, 6  ;;  %s2410_s21 = smov 88   ;;  %s2411_s22 = smov 120  }
  0x1b   :  { %v61_v5 = vld [vmem:[%s60_s14] sm:$0x1]  ;;  %v78_v8 = vrot.slane %v58_v3, 5  ;;  %v93_v13 = vsel %vm92_vm0, %v49_v0, %v72_v4  ;;  %s2409_s14 = smov 80   ;;  %s2413_s23 = smov 72  }
  0x1c   :  { %v64_v6 = vld [vmem:[%s63_s15] sm:$0x1]  ;;  %v81_v11 = vrot.slane %v61_v5, 4  ;;  %v95_v16 = vsel %vm94_vm1, %v93_v13, %v75_v7  ;;  %s2412_s15 = smov 112   ;;  %s2414_s16 = smov 104  }
  0x1d   :  { %v67_v9 = vld [vmem:[%s66_s24] sm:$0x1]  ;;  %v84_v12 = vrot.slane %v64_v6, 3  ;;  %v97_v17 = vsel %vm96_vm2, %v95_v16, %v78_v8  ;;  %s2415_s24 = smov 48   ;;  %s2416_s25 = smov 56  }
  0x1e   :  { %v70_v10 = vld [vmem:[%s69_s26] sm:$0x1]  ;;  %v87_v14 = vrot.slane %v67_v9, 2  ;;  %v99_v19 = vsel %vm98_vm3, %v97_v17, %v81_v11  ;;  %s2417_s17 = smov 40   ;;  %s2418_s19 = smov 8  }
  0x1f   :  { %v90_v15 = vrot.slane %v70_v10, 1  ;;  %v101_v20 = vsel %vm100_vm4, %v99_v19, %v84_v12  ;;  %s2419_s0 = smov 16   ;;  %s2420_s20 = smov 24  }
  0x20   :  { %v103_v21 = vsel %vm102_vm5, %v101_v20, %v87_v14  ;;  %s2421_s29 = smov [#allocation5]  }
  0x21   :  { %v105_v22 = vsel %vm104_vm6, %v103_v21, %v90_v15  ;;  %s1850_s30 = sshll.u32 %s2421_s29, 4  ;;  %s1851_s30 = int_to_ptr.vmem [resolvable:$true] %s1850_s30 }
  0x22   :  { %v2510_v23 = vadd.f32 %v106_v18, %v105_v22  ;;  %s2354_s10 = scalar_lea.vmem %s1851_s30, 128  ;;  %p2359_p13 = scmp.lt.s32.totalorder %s1851_s30, %s1851_s30 }
  0x23   :  { %p2355_p12 = scmp.ne.s32.totalorder %s1851_s30, %s2354_s10  ;;  %p2360_p0 = scmp.lt.s32.totalorder %s2354_s10, %s2354_s10 }
  0x24   :  { %v116_v24 = vsel %vm115_vm7, %v2510_v23, 0.0 }
  0x25   :  { %117 = vadd.xlane.f32.xlu0 %v116_v24  ;;  %p2361_p1 = por %p2360_p0, %p2359_p13 }
  0x27   :  { %p2362_p2 = pnand %p2361_p1, %p2355_p12 }
  0xb2   :  { %v118_v25 = vpop.xlane.xlu0 %117 }
  0xb3   :  { %v120_v26 = vmul.f32 0.03125, %v118_v25 }
  0xb5   :  { %v121_v27 = vsub.f32 %v2510_v23, %v120_v26 }
  0xb7   :  { %v122_v28 = vmul.f32 %v121_v27, %v121_v27 }
  0xb9   :  { %v123_v29 = vsel %vm115_vm7, %v122_v28, 0.0 }
  0xba   :  { %124 = vadd.xlane.f32.xlu0 %v123_v29 }
 0x147   :  { %v125_v33 = vpop.xlane.xlu0 %124 }
 0x148   :  { %v126_v34 = vmul.f32 0.03125, %v125_v33 }
 0x14a   :  { %v127_v35 = vadd.f32 1e-05, %v126_v34 }
 0x14c   :  { %2292 = vrsqrt.f32 %v127_v35 }
 0x156   :  { %v2293_v36 = vpop.eup %2292 }
 0x157   :  { %v129_v38 = vmul.f32 %v2293_v36, %v121_v27 }
 0x159   :  { %v134_v40 = vmul.f32 %v1888_v37, %v129_v38 }
 0x15b   :  { %v139_v41 = vadd.f32 %v1889_v39, %v134_v40 }
 0x15d   :  { %v140_v42 = vpack.c.bf16 %v139_v41, %v139_v41 }
 0x15f   :  { %2066 = vmatmul.mubr.msk.bf16.vlgmr.msra.gmra.mrb[0].mxu1 %vm115_vm7, %v140_v42 }
 0x160   :  { %2071 = vmatprep.mubr.msk.bf16.mxu1 %vm2406_vm8, %v2405_v31 }
 0x232   :  { %v199_v44 = vpop.f32.mrb[0].mxu1 }
 0x233   :  { %v200_v45 = vadd.f32 %v1890_v43, %v199_v44  ;;  %v2067_v46 = vpop.f32.mrb[1].mxu1 }
 0x234   :  { %v202_v47 = vpop.f32.mrb[2].mxu1 }
 0x235   :  { %v2542_v48 = vpack.c.bf16 %v200_v45, %v200_v45  ;;  %v2068_v49 = vpop.f32.mrb[3].mxu1  ;;  %v205_v52 = vmul.f32 0.35355338, %v200_v45 }
 0x237   :  { %271 = vrot.lane.b32.xlu0 %v2542_v48, %s2407_s12  ;;  %209 = vrot.lane.b32.xlu1 %v2542_v48, %s2408_s13  ;;  %v206_v54 = vpack.c.bf16 %v205_v52, %v205_v52 }
 0x2a9   :  { %v210_v50 = vpop.permute.xlu1 %209  ;;  %v272_v53 = vpop.permute.xlu0 %271 }
 0x2aa   :  { %v216_v51 = vsel %vm211_vm9, %v210_v50, 0  ;;  %v277_v55 = vsel %vm98_vm3, %v272_v53, 0 }
 0x2ab   :  { %2070 = vmatpush3.bf16.xpose.msra.mxu1 %v216_v51 }
 0x2ac   :  { %2075 = vmatprep.subr.bf16.mxu1 %v2405_v31 }
 0x2b2   :  { %2072 = vmatmul.mubr.msk.bf16.vlgmr.msra.gmra.mrb[4].mxu1 %vm211_vm9, %v206_v54 }
 0x2b3   :  { %2076 = vmatpush3.bf16.msra.mxu1 %v277_v55  ;;  %2077 = vmatprep.mubr.msk.bf16.mxu1 %vm2406_vm8, %v2405_v31 }
 0x2b4   :  { %2081 = vmatprep.subr.bf16.mxu1 %v2405_v31 }
 0x385   :  { %v252_v60 = vpop.f32.mrb[4].mxu1 }
 0x386   :  { %v258_v61 = vsel %vm2558_vm10, -3.4028235e+38, %v252_v60  ;;  %v2073_v62 = vpop.f32.mrb[5].mxu1 }
 0x387   :  { %v255_v63 = vpop.f32.mrb[6].mxu1  ;;  %v259_v0 = vsel %vm211_vm9, %v258_v61, -inf }
 0x388   :  { %260 = vmax.xlane.f32.xlu1 %v259_v0  ;;  %v2074_v1 = vpop.f32.mrb[7].mxu1 }
 0x399   :  { %433 = vrot.lane.b32.xlu1 %v2542_v48, %s2409_s14 }
 0x415   :  { %v261_v2 = vpop.xlane.xlu1 %260 }
 0x416   :  { %v262_v3 = vsub.f32 %v258_v61, %v261_v2 }
 0x418   :  { %v263_v4 = vmul.f32 1.442695, %v262_v3 }
 0x419   :  { %v434_v14 = vpop.permute.xlu1 %433 }
 0x41a   :  { %2294 = vpow2.f32 %v263_v4  ;;  %v439_v16 = vsel %vm211_vm9, %v434_v14, 0 }
 0x424   :  { %v2295_v5 = vpop.eup %2294 }
 0x425   :  { %v265_v6 = vsel %vm211_vm9, %v2295_v5, 0.0 }
 0x426   :  { %266 = vadd.xlane.f32.xlu0 %v265_v6 }
 0x43c   :  { %322 = vrot.lane.b32.xlu0 %v2542_v48, %s2410_s21 }
 0x440   :  { %320 = vrot.lane.b32.xlu0 %v206_v54, %s2411_s22 }
 0x444   :  { %431 = vrot.lane.b32.xlu0 %v206_v54, %s2412_s15 }
 0x448   :  { %544 = vrot.lane.b32.xlu0 %v2542_v48, %s2413_s23 }
 0x44c   :  { %542 = vrot.lane.b32.xlu0 %v206_v54, %s2414_s16 }
 0x4b3   :  { %v267_v7 = vpop.xlane.xlu0 %266 }
 0x4b4   :  { %2296 = vrcp.f32 %v267_v7 }
 0x4b7   :  { %v323_v9 = vpop.permute.xlu0 %322 }
 0x4b8   :  { %v328_v12 = vsel %vm211_vm9, %v323_v9, 0 }
 0x4bb   :  { %v321_v13 = vpop.permute.xlu0 %320 }
 0x4be   :  { %v2297_v8 = vpop.eup %2296 }
 0x4bf   :  { %v269_v10 = vmul.f32 %v2297_v8, %v2295_v5  ;;  %v432_v15 = vpop.permute.xlu0 %431 }
 0x4c1   :  { %v270_v11 = vpack.c.bf16 %v269_v10, %v269_v10 }
 0x4c3   :  { %2078 = vmatmul.mubr.msk.bf16.vlgmr.msra.gmra.mrb[8].mxu1 %vm211_vm9, %v270_v11  ;;  %v545_v17 = vpop.permute.xlu0 %544 }
 0x4c4   :  { %2082 = vmatpush3.bf16.xpose.msra.mxu1 %v328_v12  ;;  %2083 = vmatprep.mubr.msk.bf16.mxu1 %vm2406_vm8, %v2405_v31  ;;  %v550_v18 = vsel %vm211_vm9, %v545_v17, 0 }
 0x4c5   :  { %2093 = vmatprep.subr.bf16.mxu1 %v2405_v31 }
 0x4c7   :  { %v543_v19 = vpop.permute.xlu0 %542 }
 0x4cb   :  { %2084 = vmatmul.mubr.msk.bf16.vlgmr.msra.gmra.mrb[12].mxu1 %vm211_vm9, %v321_v13 }
 0x4cc   :  { %2094 = vmatpush3.bf16.xpose.msra.mxu1 %v439_v16  ;;  %2095 = vmatprep.mubr.msk.bf16.mxu1 %vm2406_vm8, %v2405_v31 }
 0x4cd   :  { %2105 = vmatprep.subr.bf16.mxu1 %v2405_v31 }
 0x4d3   :  { %2096 = vmatmul.mubr.msk.bf16.vlgmr.msra.gmra.mrb[16].mxu1 %vm211_vm9, %v432_v15  ;;  %v2266_v15 = vld [vmem:[%s2938_s4] sm:$0xff]  }
 0x4d4   :  { %2106 = vmatpush3.bf16.xpose.msra.mxu1 %v550_v18  ;;  %2107 = vmatprep.mubr.msk.bf16.mxu1 %vm2406_vm8, %v2405_v31 }
 0x4d5   :  { %2117 = vmatprep.subr.bf16.mxu1 %v2405_v31 }
 0x4db   :  { %2108 = vmatmul.mubr.msk.bf16.vlgmr.msra.gmra.mrb[20].mxu1 %vm211_vm9, %v543_v19 }
 0x4dc   :  { %2121 = vmatprep.mubr.msk.bf16.mxu1 %vm2406_vm8, %v2405_v31  ;;  %2118 = vmatpush3.bf16.msra.mxu1 %v2266_v15 }
 0x4dd   :  { %2119 = vmatprep.subr.bf16.mxu1 %v2405_v31 }
 0x596   :  { %v2593_v20 = vpop.f32.mrb[8].mxu1 }
 0x597   :  { %v2079_v21 = vpop.f32.mrb[9].mxu1 }
 0x598   :  { %v316_v22 = vpop.f32.mrb[10].mxu1  ;;  %v2267_v21 = vld [vmem:[%s2938_s4 + $0x8] sm:$0xff]  }
 0x599   :  { %v2080_v24 = vpop.f32.mrb[11].mxu1  ;;  %2120 = vmatpush3.bf16.msra.mxu1 %v2267_v21 }
 0x59a   :  { %2133 = vmatprep.subr.bf16.mxu1 %v2405_v31 }
 0x59e   :  { %v364_v25 = vpop.f32.mrb[12].mxu1 }
 0x59f   :  { %v370_v26 = vsel %vm2558_vm10, -3.4028235e+38, %v364_v25  ;;  %v2085_v27 = vpop.f32.mrb[13].mxu1 }
 0x5a0   :  { %v367_v28 = vpop.f32.mrb[14].mxu1  ;;  %v371_v29 = vsel %vm211_vm9, %v370_v26, -inf }
 0x5a1   :  { %372 = vmax.xlane.f32.xlu0 %v371_v29  ;;  %v2086_v30 = vpop.f32.mrb[15].mxu1 }
 0x5a6   :  { %v475_v32 = vpop.f32.mrb[16].mxu1 }
 0x5a7   :  { %v481_v33 = vsel %vm2558_vm10, -3.4028235e+38, %v475_v32  ;;  %v2097_v34 = vpop.f32.mrb[17].mxu1 }
 0x5a8   :  { %v478_v35 = vpop.f32.mrb[18].mxu1  ;;  %v482_v36 = vsel %vm211_vm9, %v481_v33, -inf }
 0x5a9   :  { %483 = vmax.xlane.f32.xlu1 %v482_v36  ;;  %v2098_v37 = vpop.f32.mrb[19].mxu1 }
 0x5ae   :  { %v586_v38 = vpop.f32.mrb[20].mxu1 }
 0x5af   :  { %v592_v39 = vsel %vm2558_vm10, -3.4028235e+38, %v586_v38  ;;  %v2109_v40 = vpop.f32.mrb[21].mxu1 }
 0x5b0   :  { %v589_v41 = vpop.f32.mrb[22].mxu1  ;;  %v593_v42 = vsel %vm211_vm9, %v592_v39, -inf }
 0x5b1   :  { %594 = vmax.xlane.f32.xlu0 %v593_v42  ;;  %v2110_v43 = vpop.f32.mrb[23].mxu1 }
 0x5ba   :  { %494 = vrot.lane.b32.xlu1 %v2542_v48, %s2415_s24 }
 0x62e   :  { %v373_v44 = vpop.xlane.xlu0 %372 }
 0x62f   :  { %v374_v45 = vsub.f32 %v370_v26, %v373_v44 }
 0x631   :  { %v375_v46 = vmul.f32 1.442695, %v374_v45 }
 0x633   :  { %2298 = vpow2.f32 %v375_v46 }
 0x636   :  { %v484_v47 = vpop.xlane.xlu1 %483 }
 0x637   :  { %v485_v49 = vsub.f32 %v481_v33, %v484_v47 }
 0x639   :  { %v486_v50 = vmul.f32 1.442695, %v485_v49 }
 0x63a   :  { %v495_v1 = vpop.permute.xlu1 %494 }
 0x63b   :  { %2300 = vpow2.f32 %v486_v50  ;;  %v500_v7 = vsel %vm98_vm3, %v495_v1, 0  ;;  %v2270_v1 = vld [vmem:[%s2940_s6] sm:$0xff]  }
 0x63d   :  { %v2299_v51 = vpop.eup %2298 }
 0x63e   :  { %v595_v52 = vpop.xlane.xlu0 %594  ;;  %v377_v53 = vsel %vm211_vm9, %v2299_v51, 0.0 }
 0x63f   :  { %v596_v54 = vsub.f32 %v592_v39, %v595_v52  ;;  %378 = vadd.xlane.f32.xlu0 %v377_v53  ;;  %v1902_v39 = vld [vmem:[%s2941_s7 + $0x4] ss:$0 sm:$0xff] }
 0x640   :  { %v2268_v52 = vld [vmem:[%s2939_s5] sm:$0xff]  }
 0x641   :  { %v597_v55 = vmul.f32 1.442695, %v596_v54 }
 0x643   :  { %2302 = vpow2.f32 %v597_v55 }
 0x645   :  { %v2301_v56 = vpop.eup %2300 }
 0x646   :  { %v488_v58 = vsel %vm211_vm9, %v2301_v56, 0.0 }
 0x647   :  { %489 = vadd.xlane.f32.xlu0 %v488_v58  ;;  %v1906_v58 = vld [vmem:[%s2941_s7 + $0x2] ss:$0 sm:$0xff] }
 0x64d   :  { %v2303_v60 = vpop.eup %2302 }
 0x64e   :  { %v599_v61 = vsel %vm211_vm9, %v2303_v60, 0.0 }
 0x64f   :  { %600 = vadd.xlane.f32.xlu1 %v599_v61  ;;  %v1907_v61 = vld [vmem:[%s2941_s7 + $0x3] ss:$0 sm:$0xff] }
 0x65d   :  { %383 = vrot.lane.b32.xlu0 %v2542_v48, %s2416_s25 }
 0x660   :  { %605 = vrot.lane.b32.xlu1 %v2542_v48, %s2417_s17 }
 0x6cc   :  { %v379_v62 = vpop.xlane.xlu0 %378 }
 0x6cd   :  { %2304 = vrcp.f32 %v379_v62 }
 0x6d4   :  { %v490_v63 = vpop.xlane.xlu0 %489 }
 0x6d5   :  { %2306 = vrcp.f32 %v490_v63 }
 0x6d7   :  { %v2305_v0 = vpop.eup %2304 }
 0x6d8   :  { %v384_v2 = vpop.permute.xlu0 %383  ;;  %v381_v3 = vmul.f32 %v2305_v0, %v2299_v51 }
 0x6d9   :  { %v389_v4 = vsel %vm98_vm3, %v384_v2, 0  ;;  %v2271_v2 = vld [vmem:[%s2940_s6 + $0x8] sm:$0xff]  }
 0x6da   :  { %2088 = vmatpush3.bf16.msra.mxu0 %v389_v4  ;;  %v382_v5 = vpack.c.bf16 %v381_v3, %v381_v3  ;;  %v2272_v3 = vld [vmem:[%s2940_s6 + $0x10] sm:$0xff]   ;;  %v2273_v4 = vld [vmem:[%s2940_s6 + $0x18] sm:$0xff]  }
 0x6db   :  { %2099 = vmatprep.subr.bf16.mxu0 %v2405_v31 }
 0x6dc   :  { %v601_v6 = vpop.xlane.xlu1 %600 }
 0x6dd   :  { %2308 = vrcp.f32 %v601_v6  ;;  %2090 = vmatmul.mubr.msk.bf16.vlgmr.msra.gmra.mrb[0].mxu0 %vm211_vm9, %v382_v5  ;;  %v2274_v5 = vld [vmem:[%s2940_s6 + $0x20] sm:$0xff]   ;;  %v2275_v6 = vld [vmem:[%s2940_s6 + $0x28] sm:$0xff]  }
 0x6de   :  { %2100 = vmatpush3.bf16.msra.mxu0 %v500_v7  ;;  %2101 = vmatprep.mubr.msk.bf16.mxu0 %vm2406_vm8, %v2405_v31  ;;  %v2276_v7 = vld [vmem:[%s2940_s6 + $0x30] sm:$0xff]  }
 0x6df   :  { %v2307_v48 = vpop.eup %2306  ;;  %2111 = vmatprep.subr.bf16.mxu0 %v2405_v31 }
 0x6e0   :  { %v492_v8 = vmul.f32 %v2307_v48, %v2301_v56  ;;  %v606_v9 = vpop.permute.xlu1 %605  ;;  %v2277_v48 = vld [vmem:[%s2940_s6 + $0x38] sm:$0xff]  }
 0x6e1   :  { %v611_v11 = vsel %vm98_vm3, %v606_v9, 0 }
 0x6e2   :  { %v493_v10 = vpack.c.bf16 %v492_v8, %v492_v8  ;;  %v1908_v8 = vld [vmem:[%s2941_s7 + $0x6] ss:$0 sm:$0xff] }
 0x6e5   :  { %2102 = vmatmul.mubr.msk.bf16.vlgmr.msra.gmra.mrb[4].mxu0 %vm211_vm9, %v493_v10 }
 0x6e6   :  { %2112 = vmatpush3.bf16.msra.mxu0 %v611_v11  ;;  %2113 = vmatprep.mubr.msk.bf16.mxu0 %vm2406_vm8, %v2405_v31 }
 0x6e7   :  { %v2309_v12 = vpop.eup %2308  ;;  %2125 = vmatprep.subr.bf16.mxu0 %v2405_v31 }
 0x6e8   :  { %v603_v13 = vmul.f32 %v2309_v12, %v2303_v60 }
 0x6ea   :  { %v604_v14 = vpack.c.bf16 %v603_v13, %v603_v13 }
 0x6ed   :  { %2114 = vmatmul.mubr.msk.bf16.vlgmr.msra.gmra.mrb[8].mxu0 %vm211_vm9, %v604_v14 }
 0x6ee   :  { %2129 = vmatprep.mubr.msk.bf16.mxu0 %vm2406_vm8, %v2405_v31  ;;  %2126 = vmatpush3.bf16.msra.mxu0 %v2268_v52 }
 0x6ef   :  { %2127 = vmatprep.subr.bf16.mxu0 %v2405_v31 }
 0x7b0   :  { %v425_v16 = vpop.f32.mrb[0].mxu0 }
 0x7b1   :  { %654 = vrot.lane.b32.xlu1 %v425_v16, %s2418_s19  ;;  %v2091_v17 = vpop.f32.mrb[1].mxu0 }
 0x7b2   :  { %v428_v18 = vpop.f32.mrb[2].mxu0 }
 0x7b3   :  { %v2092_v19 = vpop.f32.mrb[3].mxu0 }
 0x7b8   :  { %v536_v22 = vpop.f32.mrb[4].mxu0 }
 0x7b9   :  { %658 = vrot.lane.b32.xlu0 %v536_v22, %s2419_s0  ;;  %v2103_v24 = vpop.f32.mrb[5].mxu0  ;;  %v1913_v22 = vld [vmem:[%s2941_s7 + $0x5] ss:$0 sm:$0xff] }
 0x7ba   :  { %v539_v25 = vpop.f32.mrb[6].mxu0 }
 0x7bb   :  { %v2104_v26 = vpop.f32.mrb[7].mxu0 }
 0x7c0   :  { %v647_v27 = vpop.f32.mrb[8].mxu0 }
 0x7c1   :  { %662 = vrot.lane.b32.xlu1 %v647_v27, %s2420_s20  ;;  %v2115_v28 = vpop.f32.mrb[9].mxu0 }
 0x7c2   :  { %v650_v29 = vpop.f32.mrb[10].mxu0 }
 0x7c3   :  { %v2116_v30 = vpop.f32.mrb[11].mxu0 }
 0x823   :  { %v655_v32 = vpop.permute.xlu1 %654 }
 0x824   :  { %v665_v34 = vsel %vm211_vm9, %v2593_v20, %v655_v32 }
 0x82b   :  { %v659_v33 = vpop.permute.xlu0 %658 }
 0x82c   :  { %v667_v35 = vsel %vm666_vm11, %v665_v34, %v659_v33 }
 0x833   :  { %v663_v36 = vpop.permute.xlu1 %662 }
 0x834   :  { %v669_v37 = vsel %vm668_vm12, %v667_v35, %v663_v36 }
 0x835   :  { %v670_v38 = vpack.c.bf16 %v669_v37, %v669_v37  ;;  %v2278_v37 = vld [vmem:[%s2937_s3 + $0x10] sm:$0xff]  }
 0x837   :  { %2122 = vmatmul.mubr.msk.bf16.vlgmr.msra.gmra.mrb[24].mxu1 %vm115_vm7, %v670_v38  ;;  %v2279_v38 = vld [vmem:[%s2937_s3 + $0x18] sm:$0xff]  }
 0x838   :  { %2149 = vmatprep.mubr.msk.bf16.mxu1 %vm2406_vm8, %v2405_v31  ;;  %2134 = vmatpush3.bf16.msra.mxu1 %v2270_v1 }
 0x839   :  { %2135 = vmatprep.subr.bf16.mxu1 %v2405_v31 }
 0x83c   :  { %2136 = vmatpush3.bf16.msra.mxu1 %v2271_v2 }
 0x83d   :  { %2137 = vmatprep.subr.bf16.mxu1 %v2405_v31 }
 0x840   :  { %2138 = vmatpush3.bf16.msra.mxu1 %v2272_v3 }
 0x841   :  { %2139 = vmatprep.subr.bf16.mxu1 %v2405_v31 }
 0x844   :  { %2140 = vmatpush3.bf16.msra.mxu1 %v2273_v4 }
 0x845   :  { %2141 = vmatprep.subr.bf16.mxu1 %v2405_v31 }
 0x848   :  { %2142 = vmatpush3.bf16.msra.mxu1 %v2274_v5 }
 0x849   :  { %2143 = vmatprep.subr.bf16.mxu1 %v2405_v31 }
 0x84c   :  { %2144 = vmatpush3.bf16.msra.mxu1 %v2275_v6 }
 0x84d   :  { %2145 = vmatprep.subr.bf16.mxu1 %v2405_v31 }
 0x850   :  { %2146 = vmatpush3.bf16.msra.mxu1 %v2276_v7 }
 0x851   :  { %2147 = vmatprep.subr.bf16.mxu1 %v2405_v31 }
 0x854   :  { %2148 = vmatpush3.bf16.msra.mxu1 %v2277_v48 }
 0x855   :  { %2179 = vmatprep.subr.bf16.mxu1 %v2405_v31 }
 0x90a   :  { %v729_v40 = vpop.f32.mrb[24].mxu1 }
 0x90b   :  { %v730_v41 = vadd.f32 %v1902_v39, %v729_v40  ;;  %v2123_v42 = vpop.f32.mrb[25].mxu1 }
 0x90c   :  { %v732_v43 = vpop.f32.mrb[26].mxu1 }
 0x90d   :  { %v2650_v20 = vadd.f32 %v730_v41, %v2510_v23  ;;  %v2124_v44 = vpop.f32.mrb[27].mxu1  ;;  %v2269_v23 = vld [vmem:[%s2939_s5 + $0x8] sm:$0xff]  }
 0x90e   :  { %2128 = vmatpush3.bf16.msra.mxu0 %v2269_v23  ;;  %v1922_v43 = vld [vmem:[%s2941_s7 + $0x8] ss:$0 sm:$0xff]  ;;  %v1923_v44 = vld [vmem:[%s2941_s7 + $0x9] ss:$0 sm:$0xff] }
 0x90f   :  { %v738_v45 = vsel %vm115_vm7, %v2650_v20, 0.0  ;;  %2153 = vmatprep.subr.bf16.mxu0 %v2405_v31 }
 0x910   :  { %739 = vadd.xlane.f32.xlu0 %v738_v45 }
 0x99d   :  { %v740_v46 = vpop.xlane.xlu0 %739 }
 0x99e   :  { %v741_v47 = vmul.f32 0.03125, %v740_v46 }
 0x9a0   :  { %v742_v49 = vsub.f32 %v2650_v20, %v741_v47 }
 0x9a2   :  { %v743_v50 = vmul.f32 %v742_v49, %v742_v49 }
 0x9a4   :  { %v744_v51 = vsel %vm115_vm7, %v743_v50, 0.0 }
 0x9a5   :  { %745 = vadd.xlane.f32.xlu1 %v744_v51 }
 0xa32   :  { %v746_v53 = vpop.xlane.xlu1 %745 }
 0xa33   :  { %v747_v54 = vmul.f32 0.03125, %v746_v53 }
 0xa35   :  { %v748_v55 = vadd.f32 1e-05, %v747_v54 }
 0xa37   :  { %2310 = vrsqrt.f32 %v748_v55 }
 0xa41   :  { %v2311_v56 = vpop.eup %2310 }
 0xa42   :  { %v750_v60 = vmul.f32 %v2311_v56, %v742_v49  ;;  %v1928_v49 = vld [vmem:[%s2941_s7 + $0xf] ss:$0 sm:$0xff] }
 0xa44   :  { %v755_v62 = vmul.f32 %v1906_v58, %v750_v60 }
 0xa46   :  { %v760_v63 = vadd.f32 %v1907_v61, %v755_v62 }
 0xa48   :  { %v761_v0 = vpack.c.bf16 %v760_v63, %v760_v63 }
 0xa4a   :  { %2130 = vmatmul.mubr.msk.bf16.vlgmr.msra.gmra.mrb[12].mxu0 %vm115_vm7, %v761_v0 }
 0xa4b   :  { %2157 = vmatprep.mubr.msk.bf16.mxu0 %vm2406_vm8, %v2405_v31  ;;  %2154 = vmatpush3.bf16.msra.mxu0 %v2278_v37 }
 0xa4c   :  { %2155 = vmatprep.subr.bf16.mxu0 %v2405_v31 }
 0xa4f   :  { %2156 = vmatpush3.bf16.msra.mxu0 %v2279_v38 }
 0xa50   :  { %2161 = vmatprep.subr.bf16.mxu0 %v2405_v31 }
 0xb1d   :  { %v820_v9 = vpop.f32.mrb[12].mxu0 }
 0xb1e   :  { %v821_v10 = vadd.f32 %v1908_v8, %v820_v9  ;;  %v2131_v11 = vpop.f32.mrb[13].mxu0 }
 0xb1f   :  { %v823_v12 = vpop.f32.mrb[14].mxu0 }
 0xb20   :  { %v1912_v13 = vmul.f32 -1.702, %v821_v10  ;;  %v2132_v14 = vpop.f32.mrb[15].mxu0 }
 0xb22   :  { %v828_v15 = vmul.f32 1.442695, %v1912_v13 }
 0xb24   :  { %2312 = vpow2.f32 %v828_v15 }
 0xb2e   :  { %v2313_v16 = vpop.eup %2312 }
 0xb2f   :  { %v830_v17 = vadd.f32 1.0, %v2313_v16 }
 0xb31   :  { %2314 = vrcp.f32 %v830_v17 }
 0xb3b   :  { %v2315_v18 = vpop.eup %2314 }
 0xb3c   :  { %v833_v19 = vmul.f32 %v2315_v18, %v821_v10 }
 0xb3e   :  { %v834_v21 = vpack.c.bf16 %v833_v19, %v833_v19 }
 0xb40   :  { %2150 = vmatmul.mubr.bf16.vlgmr.msra.gmra.mrb[28].mxu1 %v834_v21 }
 0xb41   :  { %2181 = vmatprep.mubr.msk.bf16.mxu1 %vm2406_vm8, %v2405_v31 }
 0xc13   :  { %v938_v24 = vpop.f32.mrb[28].mxu1 }
 0xc14   :  { %v939_v25 = vadd.f32 %v1913_v22, %v938_v24  ;;  %v2151_v26 = vpop.f32.mrb[29].mxu1 }
 0xc15   :  { %v941_v27 = vpop.f32.mrb[30].mxu1 }
 0xc16   :  { %v2714_v28 = vadd.f32 %v939_v25, %v2650_v20  ;;  %v2152_v29 = vpop.f32.mrb[31].mxu1 }
 0xc18   :  { %v947_v30 = vsel %vm115_vm7, %v2714_v28, 0.0 }
 0xc19   :  { %948 = vadd.xlane.f32.xlu0 %v947_v30 }
 0xca6   :  { %v949_v32 = vpop.xlane.xlu0 %948 }
 0xca7   :  { %v950_v33 = vmul.f32 0.03125, %v949_v32 }
 0xca9   :  { %v951_v34 = vsub.f32 %v2714_v28, %v950_v33 }
 0xcab   :  { %v952_v35 = vmul.f32 %v951_v34, %v951_v34 }
 0xcad   :  { %v953_v36 = vsel %vm115_vm7, %v952_v35, 0.0 }
 0xcae   :  { %954 = vadd.xlane.f32.xlu0 %v953_v36 }
 0xd3b   :  { %v955_v39 = vpop.xlane.xlu0 %954 }
 0xd3c   :  { %v956_v40 = vmul.f32 0.03125, %v955_v39 }
 0xd3e   :  { %v957_v41 = vadd.f32 1e-05, %v956_v40 }
 0xd40   :  { %2316 = vrsqrt.f32 %v957_v41 }
 0xd4a   :  { %v2317_v42 = vpop.eup %2316 }
 0xd4b   :  { %v959_v20 = vmul.f32 %v2317_v42, %v951_v34 }
 0xd4d   :  { %v964_v45 = vmul.f32 %v1922_v43, %v959_v20 }
 0xd4f   :  { %v969_v46 = vadd.f32 %v1923_v44, %v964_v45 }
 0xd51   :  { %v970_v47 = vpack.c.bf16 %v969_v46, %v969_v46 }
 0xd53   :  { %2158 = vmatmul.mubr.msk.bf16.vlgmr.msra.gmra.mrb[16].mxu0 %vm115_vm7, %v970_v47 }
 0xd54   :  { %2163 = vmatprep.mubr.msk.bf16.mxu0 %vm2406_vm8, %v2405_v31 }
 0xe26   :  { %v1030_v50 = vpop.f32.mrb[16].mxu0 }
 0xe27   :  { %v1031_v51 = vadd.f32 %v1928_v49, %v1030_v50  ;;  %v2159_v52 = vpop.f32.mrb[17].mxu0 }
 0xe28   :  { %v1033_v23 = vpop.f32.mrb[18].mxu0 }
 0xe29   :  { %v2740_v53 = vpack.c.bf16 %v1031_v51, %v1031_v51  ;;  %v2160_v54 = vpop.f32.mrb[19].mxu0  ;;  %v1036_v58 = vmul.f32 0.35355338, %v1031_v51 }
 0xe2b   :  { %1040 = vrot.lane.b32.xlu0 %v2740_v53, %s2408_s13  ;;  %v1037_v60 = vpack.c.bf16 %v1036_v58, %v1036_v58 }
 0xe2f   :  { %1152 = vrot.lane.b32.xlu0 %v2740_v53, %s2410_s21 }
 0xe33   :  { %1263 = vrot.lane.b32.xlu0 %v2740_v53, %s2409_s14 }
 0xe37   :  { %1374 = vrot.lane.b32.xlu0 %v2740_v53, %s2413_s23  ;;  %s1986_s23 = sld [smem:[#allocation2 + $0x1]] }
 0xe9d   :  { %v1041_v55 = vpop.permute.xlu0 %1040 }
 0xe9e   :  { %v1046_v56 = vsel %vm211_vm9, %v1041_v55, 0 }
 0xe9f   :  { %2162 = vmatpush3.bf16.xpose.msra.mxu0 %v1046_v56 }
 0xea0   :  { %2167 = vmatprep.subr.bf16.mxu0 %v2405_v31 }
 0xea1   :  { %v1153_v12 = vpop.permute.xlu0 %1152 }
 0xea2   :  { %v1158_v14 = vsel %vm211_vm9, %v1153_v12, 0 }
 0xea5   :  { %v1264_v15 = vpop.permute.xlu0 %1263 }
 0xea6   :  { %2164 = vmatmul.mubr.msk.bf16.vlgmr.msra.gmra.mrb[20].mxu0 %vm211_vm9, %v1037_v60  ;;  %v1269_v17 = vsel %vm211_vm9, %v1264_v15, 0 }
 0xea7   :  { %2169 = vmatprep.mubr.msk.bf16.mxu0 %vm2406_vm8, %v2405_v31 }
 0xea9   :  { %v1375_v18 = vpop.permute.xlu0 %1374 }
 0xeaa   :  { %v1380_v21 = vsel %vm211_vm9, %v1375_v18, 0 }
 0xf79   :  { %v1082_v61 = vpop.f32.mrb[20].mxu0 }
 0xf7a   :  { %v1088_v62 = vsel %vm2558_vm10, -3.4028235e+38, %v1082_v61  ;;  %v2165_v63 = vpop.f32.mrb[21].mxu0 }
 0xf7b   :  { %v1085_v0 = vpop.f32.mrb[22].mxu0  ;;  %v1089_v1 = vsel %vm211_vm9, %v1088_v62, -inf }
 0xf7c   :  { %1090 = vmax.xlane.f32.xlu1 %v1089_v1  ;;  %v2166_v2 = vpop.f32.mrb[23].mxu0 }
0x1009   :  { %v1091_v3 = vpop.xlane.xlu1 %1090 }
0x100a   :  { %v1092_v4 = vsub.f32 %v1088_v62, %v1091_v3 }
0x100c   :  { %v1093_v5 = vmul.f32 1.442695, %v1092_v4 }
0x100e   :  { %2318 = vpow2.f32 %v1093_v5 }
0x1018   :  { %v2319_v6 = vpop.eup %2318 }
0x1019   :  { %v1095_v7 = vsel %vm211_vm9, %v2319_v6, 0.0 }
0x101a   :  { %1096 = vadd.xlane.f32.xlu1 %v1095_v7 }
0x102b   :  { %1101 = vrot.lane.b32.xlu1 %v2740_v53, %s2407_s12 }
0x102f   :  { %1150 = vrot.lane.b32.xlu1 %v1037_v60, %s2411_s22 }
0x1033   :  { %1261 = vrot.lane.b32.xlu1 %v1037_v60, %s2412_s15  ;;  %s1802_s15 = sld [smem:[#allocation2]] }
0x1037   :  { %1372 = vrot.lane.b32.xlu1 %v1037_v60, %s2414_s16  ;;  %s1987_s16 = sld [smem:[#allocation2 + $0x2]] }
0x1039   :  { %p1804_p5 = scmp.gt.s32.totalorder %s1986_s23, %s1802_s15 }
0x103b   :  { %s2947_s23 = smov (!%p1804_p5, %s1986_s23), %s1802_s15 }
0x103d   :  { %p1808_p6 = scmp.gt.s32.totalorder %s1987_s16, %s2947_s23 }
0x103f   :  { %s2949_s16 = smov (!%p1808_p6, %s1987_s16), %s2947_s23 }
0x10a7   :  { %v1097_v48 = vpop.xlane.xlu1 %1096 }
0x10a8   :  { %2320 = vrcp.f32 %v1097_v48 }
0x10ab   :  { %v1102_v8 = vpop.permute.xlu1 %1101 }
0x10ac   :  { %v1107_v9 = vsel %vm98_vm3, %v1102_v8, 0 }
0x10ad   :  { %2168 = vmatpush3.bf16.msra.mxu0 %v1107_v9 }
0x10ae   :  { %2173 = vmatprep.subr.bf16.mxu0 %v2405_v31 }
0x10af   :  { %v1151_v16 = vpop.permute.xlu1 %1150 }
0x10b2   :  { %v2321_v10 = vpop.eup %2320 }
0x10b3   :  { %v1099_v11 = vmul.f32 %v2321_v10, %v2319_v6  ;;  %v1262_v19 = vpop.permute.xlu1 %1261 }
0x10b5   :  { %v1100_v13 = vpack.c.bf16 %v1099_v11, %v1099_v11 }
0x10b7   :  { %2170 = vmatmul.mubr.msk.bf16.vlgmr.msra.gmra.mrb[24].mxu0 %vm211_vm9, %v1100_v13  ;;  %v1373_v22 = vpop.permute.xlu1 %1372 }
0x10b8   :  { %2174 = vmatpush3.bf16.xpose.msra.mxu0 %v1158_v14  ;;  %2175 = vmatprep.mubr.msk.bf16.mxu0 %vm2406_vm8, %v2405_v31 }
0x10b9   :  { %2185 = vmatprep.subr.bf16.mxu0 %v2405_v31 }
0x10bf   :  { %2176 = vmatmul.mubr.msk.bf16.vlgmr.msra.gmra.mrb[28].mxu0 %vm211_vm9, %v1151_v16  ;;  %v2280_v16 = vld [vmem:[%s2938_s4 + $0x10] sm:$0xff]  }
0x10c0   :  { %2186 = vmatpush3.bf16.xpose.msra.mxu0 %v1269_v17  ;;  %2187 = vmatprep.mubr.msk.bf16.mxu0 %vm2406_vm8, %v2405_v31 }
0x10c1   :  { %2197 = vmatprep.subr.bf16.mxu0 %v2405_v31 }
0x10c7   :  { %2188 = vmatmul.mubr.msk.bf16.vlgmr.msra.gmra.mrb[32].mxu0 %vm211_vm9, %v1262_v19 }
0x10c8   :  { %2198 = vmatpush3.bf16.xpose.msra.mxu0 %v1380_v21  ;;  %2199 = vmatprep.mubr.msk.bf16.mxu0 %vm2406_vm8, %v2405_v31 }
0x10c9   :  { %2209 = vmatprep.subr.bf16.mxu0 %v2405_v31 }
0x10cf   :  { %2200 = vmatmul.mubr.msk.bf16.vlgmr.msra.gmra.mrb[36].mxu0 %vm211_vm9, %v1373_v22  ;;  %v2281_v22 = vld [vmem:[%s2938_s4 + $0x18] sm:$0xff]  }
0x10d0   :  { %2213 = vmatprep.mubr.msk.bf16.mxu0 %vm2406_vm8, %v2405_v31  ;;  %2210 = vmatpush3.bf16.msra.mxu0 %v2280_v16 }
0x10d1   :  { %2211 = vmatprep.subr.bf16.mxu0 %v2405_v31 }
0x10d4   :  { %2212 = vmatpush3.bf16.msra.mxu0 %v2281_v22 }
0x10d5   :  { %2225 = vmatprep.subr.bf16.mxu0 %v2405_v31 }
0x118a   :  { %v2784_v24 = vpop.f32.mrb[24].mxu0 }
0x118b   :  { %v2171_v25 = vpop.f32.mrb[25].mxu0 }
0x118c   :  { %v1146_v26 = vpop.f32.mrb[26].mxu0 }
0x118d   :  { %v2172_v27 = vpop.f32.mrb[27].mxu0 }
0x1192   :  { %v1194_v29 = vpop.f32.mrb[28].mxu0 }
0x1193   :  { %v1200_v30 = vsel %vm2558_vm10, -3.4028235e+38, %v1194_v29  ;;  %v2177_v32 = vpop.f32.mrb[29].mxu0 }
0x1194   :  { %v1197_v33 = vpop.f32.mrb[30].mxu0  ;;  %v1201_v34 = vsel %vm211_vm9, %v1200_v30, -inf }
0x1195   :  { %1202 = vmax.xlane.f32.xlu0 %v1201_v34  ;;  %v2178_v35 = vpop.f32.mrb[31].mxu0 }
0x119a   :  { %v1305_v36 = vpop.f32.mrb[32].mxu0 }
0x119b   :  { %v1311_v37 = vsel %vm2558_vm10, -3.4028235e+38, %v1305_v36  ;;  %v2189_v38 = vpop.f32.mrb[33].mxu0 }
0x119c   :  { %v1308_v39 = vpop.f32.mrb[34].mxu0  ;;  %v1312_v40 = vsel %vm211_vm9, %v1311_v37, -inf }
0x119d   :  { %1313 = vmax.xlane.f32.xlu1 %v1312_v40  ;;  %v2190_v41 = vpop.f32.mrb[35].mxu0 }
0x11a2   :  { %v1416_v42 = vpop.f32.mrb[36].mxu0 }
0x11a3   :  { %v1422_v43 = vsel %vm2558_vm10, -3.4028235e+38, %v1416_v42  ;;  %v2201_v20 = vpop.f32.mrb[37].mxu0  ;;  %v1944_v42 = vld [vmem:[%s2941_s7 + $0xc] ss:$0 sm:$0xff] }
0x11a4   :  { %v1419_v44 = vpop.f32.mrb[38].mxu0  ;;  %v1423_v45 = vsel %vm211_vm9, %v1422_v43, -inf }
0x11a5   :  { %1424 = vmax.xlane.f32.xlu0 %v1423_v45  ;;  %v2202_v46 = vpop.f32.mrb[39].mxu0 }
0x11ae   :  { %1324 = vrot.lane.b32.xlu1 %v2740_v53, %s2415_s24  ;;  %s1988_s24 = sld [smem:[#allocation2 + $0x3]] }
0x11b4   :  { %p1812_p7 = scmp.gt.s32.totalorder %s1988_s24, %s2949_s16 }
0x11b6   :  { %s2951_s24 = smov (!%p1812_p7, %s1988_s24), %s2949_s16 }
0x1222   :  { %v1203_v47 = vpop.xlane.xlu0 %1202 }
0x1223   :  { %v1204_v49 = vsub.f32 %v1200_v30, %v1203_v47 }
0x1225   :  { %v1205_v50 = vmul.f32 1.442695, %v1204_v49 }
0x1227   :  { %2322 = vpow2.f32 %v1205_v50 }
0x122a   :  { %v1314_v51 = vpop.xlane.xlu1 %1313 }
0x122b   :  { %v1315_v52 = vsub.f32 %v1311_v37, %v1314_v51 }
0x122d   :  { %v1316_v23 = vmul.f32 1.442695, %v1315_v52 }
0x122e   :  { %v1325_v3 = vpop.permute.xlu1 %1324 }
0x122f   :  { %2324 = vpow2.f32 %v1316_v23  ;;  %v1330_v8 = vsel %vm98_vm3, %v1325_v3, 0  ;;  %v2285_v3 = vld [vmem:[%s2940_s6 + $0x48] sm:$0xff]  }
0x1231   :  { %v2323_v54 = vpop.eup %2322 }
0x1232   :  { %v1425_v59 = vpop.xlane.xlu0 %1424  ;;  %v1207_v55 = vsel %vm211_vm9, %v2323_v54, 0.0 }
0x1233   :  { %v1426_v56 = vsub.f32 %v1422_v43, %v1425_v59  ;;  %1208 = vadd.xlane.f32.xlu0 %v1207_v55 }
0x1235   :  { %v1427_v58 = vmul.f32 1.442695, %v1426_v56 }
0x1237   :  { %2326 = vpow2.f32 %v1427_v58 }
0x1239   :  { %v2325_v60 = vpop.eup %2324 }
0x123a   :  { %v1318_v61 = vsel %vm211_vm9, %v2325_v60, 0.0 }
0x123b   :  { %1319 = vadd.xlane.f32.xlu0 %v1318_v61 }
0x1241   :  { %v2327_v62 = vpop.eup %2326 }
0x1242   :  { %v1429_v63 = vsel %vm211_vm9, %v2327_v62, 0.0 }
0x1243   :  { %1430 = vadd.xlane.f32.xlu1 %v1429_v63 }
0x1251   :  { %1213 = vrot.lane.b32.xlu0 %v2740_v53, %s2416_s25  ;;  %s1989_s25 = sld [smem:[#allocation2 + $0x4]] }
0x1254   :  { %1435 = vrot.lane.b32.xlu1 %v2740_v53, %s2417_s17  ;;  %s1990_s17 = sld [smem:[#allocation2 + $0x5]] }
0x1257   :  { %p1816_p8 = scmp.gt.s32.totalorder %s1989_s25, %s2951_s24 }
0x1259   :  { %s2953_s25 = smov (!%p1816_p8, %s1989_s25), %s2951_s24 }
0x125a   :  { %p1820_p9 = scmp.gt.s32.totalorder %s1990_s17, %s2953_s25 }
0x125c   :  { %s2959_s17 = smov (!%p1820_p9, %s1990_s17), %s2953_s25 }
0x12c0   :  { %v1209_v0 = vpop.xlane.xlu0 %1208 }
0x12c1   :  { %2328 = vrcp.f32 %v1209_v0 }
0x12c8   :  { %v1320_v1 = vpop.xlane.xlu0 %1319 }
0x12c9   :  { %2330 = vrcp.f32 %v1320_v1 }
0x12cb   :  { %v2329_v2 = vpop.eup %2328 }
0x12cc   :  { %v1211_v4 = vmul.f32 %v2329_v2, %v2323_v54  ;;  %v1214_v5 = vpop.permute.xlu0 %1213  ;;  %v2282_v54 = vld [vmem:[%s2939_s5 + $0x10] sm:$0xff]   ;;  %v2284_v2 = vld [vmem:[%s2940_s6 + $0x40] sm:$0xff]  }
0x12cd   :  { %v1219_v6 = vsel %vm98_vm3, %v1214_v5, 0  ;;  %v2287_v5 = vld [vmem:[%s2940_s6 + $0x58] sm:$0xff]  }
0x12ce   :  { %2180 = vmatpush3.bf16.msra.mxu1 %v1219_v6  ;;  %v1212_v7 = vpack.c.bf16 %v1211_v4, %v1211_v4  ;;  %v2286_v4 = vld [vmem:[%s2940_s6 + $0x50] sm:$0xff]   ;;  %v2288_v6 = vld [vmem:[%s2940_s6 + $0x60] sm:$0xff]  }
0x12cf   :  { %2191 = vmatprep.subr.bf16.mxu1 %v2405_v31 }
0x12d0   :  { %v1431_v48 = vpop.xlane.xlu1 %1430 }
0x12d1   :  { %2332 = vrcp.f32 %v1431_v48  ;;  %2182 = vmatmul.mubr.msk.bf16.vlgmr.msra.gmra.mrb[32].mxu1 %vm211_vm9, %v1212_v7  ;;  %v2289_v7 = vld [vmem:[%s2940_s6 + $0x68] sm:$0xff]   ;;  %v2290_v48 = vld [vmem:[%s2940_s6 + $0x70] sm:$0xff]  }
0x12d2   :  { %2192 = vmatpush3.bf16.msra.mxu1 %v1330_v8  ;;  %2193 = vmatprep.mubr.msk.bf16.mxu1 %vm2406_vm8, %v2405_v31  ;;  %v2291_v8 = vld [vmem:[%s2940_s6 + $0x78] sm:$0xff]  }
0x12d3   :  { %v2331_v53 = vpop.eup %2330  ;;  %2203 = vmatprep.subr.bf16.mxu1 %v2405_v31 }
0x12d4   :  { %v1322_v9 = vmul.f32 %v2331_v53, %v2325_v60  ;;  %v1436_v10 = vpop.permute.xlu1 %1435  ;;  %v1948_v60 = vld [vmem:[%s2941_s7 + $0xa] ss:$0 sm:$0xff]  ;;  %v1954_v53 = vld [vmem:[%s2941_s7 + $0xe] ss:$0 sm:$0xff] }
0x12d5   :  { %v1441_v12 = vsel %vm98_vm3, %v1436_v10, 0 }
0x12d6   :  { %v1323_v11 = vpack.c.bf16 %v1322_v9, %v1322_v9 }
0x12d9   :  { %2194 = vmatmul.mubr.msk.bf16.vlgmr.msra.gmra.mrb[36].mxu1 %vm211_vm9, %v1323_v11 }
0x12da   :  { %2204 = vmatpush3.bf16.msra.mxu1 %v1441_v12  ;;  %2205 = vmatprep.mubr.msk.bf16.mxu1 %vm2406_vm8, %v2405_v31 }
0x12db   :  { %v2333_v13 = vpop.eup %2332  ;;  %2217 = vmatprep.subr.bf16.mxu1 %v2405_v31 }
0x12dc   :  { %v1433_v14 = vmul.f32 %v2333_v13, %v2327_v62  ;;  %v1949_v62 = vld [vmem:[%s2941_s7 + $0xb] ss:$0 sm:$0xff] }
0x12de   :  { %v1434_v15 = vpack.c.bf16 %v1433_v14, %v1433_v14 }
0x12e1   :  { %2206 = vmatmul.mubr.msk.bf16.vlgmr.msra.gmra.mrb[40].mxu1 %vm211_vm9, %v1434_v15 }
0x12e2   :  { %2221 = vmatprep.mubr.msk.bf16.mxu1 %vm2406_vm8, %v2405_v31  ;;  %2218 = vmatpush3.bf16.msra.mxu1 %v2282_v54 }
0x12e3   :  { %2219 = vmatprep.subr.bf16.mxu1 %v2405_v31 }
0x13a4   :  { %v1255_v17 = vpop.f32.mrb[32].mxu1 }
0x13a5   :  { %1484 = vrot.lane.b32.xlu1 %v1255_v17, %s2418_s19  ;;  %v2183_v18 = vpop.f32.mrb[33].mxu1  ;;  %s1805_s19 = scalar_select %p1804_p5, 1, 0 }
0x13a6   :  { %v1258_v19 = vpop.f32.mrb[34].mxu1 }
0x13a7   :  { %v2184_v21 = vpop.f32.mrb[35].mxu1  ;;  %s2955_s19 = smov (%p1808_p6, %s1805_s19), 2 }
0x13a8   :  { %v1975_v21 = vld [vmem:[%s2941_s7 + $0xd] ss:$0 sm:$0xff]  ;;  %s2957_s19 = smov (%p1812_p7, %s2955_s19), 3 }
0x13a9   :  { %s2961_s19 = smov (%p1816_p8, %s2957_s19), 4 }
0x13aa   :  { %s2963_s19 = smov (%p1820_p9, %s2961_s19), 5 }
0x13ac   :  { %v1366_v25 = vpop.f32.mrb[36].mxu1 }
0x13ad   :  { %1488 = vrot.lane.b32.xlu0 %v1366_v25, %s2419_s0  ;;  %v2195_v26 = vpop.f32.mrb[37].mxu1  ;;  %s1991_s0 = sld [smem:[#allocation2 + $0x6]] }
0x13ae   :  { %v1369_v27 = vpop.f32.mrb[38].mxu1 }
0x13af   :  { %v2196_v29 = vpop.f32.mrb[39].mxu1 }
0x13b3   :  { %p1824_p10 = scmp.gt.s32.totalorder %s1991_s0, %s2959_s17 }
0x13b4   :  { %v1477_v30 = vpop.f32.mrb[40].mxu1 }
0x13b5   :  { %1492 = vrot.lane.b32.xlu1 %v1477_v30, %s2420_s20  ;;  %v2207_v32 = vpop.f32.mrb[41].mxu1  ;;  %s2965_s0 = smov (!%p1824_p10, %s1991_s0), %s2959_s17  ;;  %s2967_s19 = smov (%p1824_p10, %s2963_s19), 6 }
0x13b6   :  { %v1480_v33 = vpop.f32.mrb[42].mxu1 }
0x13b7   :  { %v2208_v34 = vpop.f32.mrb[43].mxu1 }
0x1417   :  { %v1485_v35 = vpop.permute.xlu1 %1484 }
0x1418   :  { %v1495_v37 = vsel %vm211_vm9, %v2784_v24, %v1485_v35 }
0x141f   :  { %v1489_v36 = vpop.permute.xlu0 %1488 }
0x1420   :  { %v1496_v38 = vsel %vm666_vm11, %v1495_v37, %v1489_v36 }
0x1427   :  { %v1493_v39 = vpop.permute.xlu1 %1492 }
0x1428   :  { %v1497_v40 = vsel %vm668_vm12, %v1496_v38, %v1493_v39 }
0x1429   :  { %v1498_v41 = vpack.c.bf16 %v1497_v40, %v1497_v40 }
0x142b   :  { %2214 = vmatmul.mubr.msk.bf16.vlgmr.msra.gmra.mrb[40].mxu0 %vm115_vm7, %v1498_v41 }
0x142c   :  { %2241 = vmatprep.mubr.msk.bf16.mxu0 %vm2406_vm8, %v2405_v31  ;;  %2226 = vmatpush3.bf16.msra.mxu0 %v2284_v2 }
0x142d   :  { %2227 = vmatprep.subr.bf16.mxu0 %v2405_v31 }
0x1430   :  { %2228 = vmatpush3.bf16.msra.mxu0 %v2285_v3 }
0x1431   :  { %2229 = vmatprep.subr.bf16.mxu0 %v2405_v31 }
0x1434   :  { %2230 = vmatpush3.bf16.msra.mxu0 %v2286_v4 }
0x1435   :  { %2231 = vmatprep.subr.bf16.mxu0 %v2405_v31 }
0x1438   :  { %2232 = vmatpush3.bf16.msra.mxu0 %v2287_v5 }
0x1439   :  { %2233 = vmatprep.subr.bf16.mxu0 %v2405_v31 }
0x143c   :  { %2234 = vmatpush3.bf16.msra.mxu0 %v2288_v6 }
0x143d   :  { %2235 = vmatprep.subr.bf16.mxu0 %v2405_v31 }
0x1440   :  { %2236 = vmatpush3.bf16.msra.mxu0 %v2289_v7 }
0x1441   :  { %2237 = vmatprep.subr.bf16.mxu0 %v2405_v31 }
0x1444   :  { %2238 = vmatpush3.bf16.msra.mxu0 %v2290_v48 }
0x1445   :  { %2239 = vmatprep.subr.bf16.mxu0 %v2405_v31 }
0x1448   :  { %2240 = vmatpush3.bf16.msra.mxu0 %v2291_v8 }
0x14fe   :  { %v1558_v43 = vpop.f32.mrb[40].mxu0 }
0x14ff   :  { %v1559_v20 = vadd.f32 %v1944_v42, %v1558_v43  ;;  %v2215_v44 = vpop.f32.mrb[41].mxu0  ;;  %v1984_v42 = vld [vmem:[%s2941_s7 + $0x10] ss:$0 sm:$0xff] }
0x1500   :  { %v1561_v45 = vpop.f32.mrb[42].mxu0  ;;  %v1985_v44 = vld [vmem:[%s2941_s7 + $0x11] ss:$0 sm:$0xff] }
0x1501   :  { %v2841_v24 = vadd.f32 %v1559_v20, %v2714_v28  ;;  %v2216_v46 = vpop.f32.mrb[43].mxu0  ;;  %v2283_v28 = vld [vmem:[%s2939_s5 + $0x18] sm:$0xff]   ;;  %s1992_s5 = sld [smem:[#allocation2 + $0x7]] }
0x1502   :  { %2220 = vmatpush3.bf16.msra.mxu1 %v2283_v28 }
0x1503   :  { %v1567_v47 = vsel %vm115_vm7, %v2841_v24, 0.0 }
0x1504   :  { %1568 = vadd.xlane.f32.xlu0 %v1567_v47 }
0x1507   :  { %p1828_p11 = scmp.gt.s32.totalorder %s1992_s5, %s2965_s0 }
0x1509   :  { %s2969_s19 = smov (%p1828_p11, %s2967_s19), 7 }
0x150a   :  { %v1830_v20 = vstv %s2969_s19 }
0x150b   :  { %vm1831_vm13 = vcmp.eq.s32.totalorder %v2555_v57, %v1830_v20 }
0x1591   :  { %v1569_v49 = vpop.xlane.xlu0 %1568 }
0x1592   :  { %v1570_v50 = vmul.f32 0.03125, %v1569_v49 }
0x1594   :  { %v1571_v51 = vsub.f32 %v2841_v24, %v1570_v50 }
0x1596   :  { %v1572_v52 = vmul.f32 %v1571_v51, %v1571_v51 }
0x1598   :  { %v1573_v23 = vsel %vm115_vm7, %v1572_v52, 0.0 }
0x1599   :  { %1574 = vadd.xlane.f32.xlu1 %v1573_v23 }
0x1626   :  { %v1575_v59 = vpop.xlane.xlu1 %1574 }
0x1627   :  { %v1576_v55 = vmul.f32 0.03125, %v1575_v59 }
0x1629   :  { %v1577_v56 = vadd.f32 1e-05, %v1576_v55 }
0x162b   :  { %2334 = vrsqrt.f32 %v1577_v56 }
0x1635   :  { %v2335_v58 = vpop.eup %2334 }
0x1636   :  { %v1579_v61 = vmul.f32 %v2335_v58, %v1571_v51 }
0x1638   :  { %v1584_v63 = vmul.f32 %v1948_v60, %v1579_v61 }
0x163a   :  { %v1589_v0 = vadd.f32 %v1949_v62, %v1584_v63 }
0x163c   :  { %v1590_v1 = vpack.c.bf16 %v1589_v0, %v1589_v0 }
0x163e   :  { %2222 = vmatmul.mubr.msk.bf16.vlgmr.msra.gmra.mrb[44].mxu1 %vm115_vm7, %v1590_v1 }
0x1711   :  { %v1650_v9 = vpop.f32.mrb[44].mxu1 }
0x1712   :  { %v1651_v10 = vadd.f32 %v1954_v53, %v1650_v9  ;;  %v2223_v11 = vpop.f32.mrb[45].mxu1 }
0x1713   :  { %v1653_v12 = vpop.f32.mrb[46].mxu1 }
0x1714   :  { %v1958_v13 = vmul.f32 -1.702, %v1651_v10  ;;  %v2224_v14 = vpop.f32.mrb[47].mxu1 }
0x1716   :  { %v1658_v15 = vmul.f32 1.442695, %v1958_v13 }
0x1718   :  { %2336 = vpow2.f32 %v1658_v15 }
0x1722   :  { %v2337_v16 = vpop.eup %2336 }
0x1723   :  { %v1660_v17 = vadd.f32 1.0, %v2337_v16 }
0x1725   :  { %2338 = vrcp.f32 %v1660_v17 }
0x172f   :  { %v2339_v31 = vpop.eup %2338 }
0x1730   :  { %v1663_v18 = vmul.f32 %v2339_v31, %v1651_v10 }
0x1732   :  { %v1664_v19 = vpack.c.bf16 %v1663_v18, %v1663_v18 }
0x1734   :  { %2242 = vmatmul.mubr.bf16.vlgmr.msra.gmra.mrb[44].mxu0 %v1664_v19 }
0x1807   :  { %v1769_v22 = vpop.f32.mrb[44].mxu0 }
0x1808   :  { %v1770_v25 = vadd.f32 %v1975_v21, %v1769_v22  ;;  %v2243_v26 = vpop.f32.mrb[45].mxu0 }
0x1809   :  { %v1772_v27 = vpop.f32.mrb[46].mxu0 }
0x180a   :  { %v2244_v29 = vpop.f32.mrb[47].mxu0  ;;  %v1775_v30 = vadd.f32 %v1770_v25, %v2841_v24 }
0x180c   :  { %v1778_v32 = vsel %vm115_vm7, %v1775_v30, 0.0 }
0x180d   :  { %1779 = vadd.xlane.f32.xlu0 %v1778_v32 }
0x189a   :  { %v1780_v33 = vpop.xlane.xlu0 %1779 }
0x189b   :  { %v1781_v34 = vmul.f32 0.03125, %v1780_v33 }
0x189d   :  { %v1782_v35 = vsub.f32 %v1775_v30, %v1781_v34 }
0x189f   :  { %v1783_v36 = vmul.f32 %v1782_v35, %v1782_v35 }
0x18a1   :  { %v1784_v37 = vsel %vm115_vm7, %v1783_v36, 0.0 }
0x18a2   :  { %1785 = vadd.xlane.f32.xlu0 %v1784_v37 }
0x192f   :  { %v1786_v38 = vpop.xlane.xlu0 %1785 }
0x1930   :  { %v1787_v39 = vmul.f32 0.03125, %v1786_v38 }
0x1932   :  { %v1788_v40 = vadd.f32 1e-05, %v1787_v39 }
0x1934   :  { %2340 = vrsqrt.f32 %v1788_v40 }
0x193e   :  { %v2341_v41 = vpop.eup %2340 }
0x193f   :  { %v1790_v43 = vmul.f32 %v2341_v41, %v1782_v35 }
0x1941   :  { %v1795_v45 = vmul.f32 %v1984_v42, %v1790_v43 }
0x1943   :  { %v1800_v24 = vadd.f32 %v1985_v44, %v1795_v45 }
0x1945   :  { %1801 = vst.msk [vmem:[#allocation5] sm:$0xff] %vm115_vm7, %v1800_v24  ;;  %v1834_v46 = vsel %vm1831_vm13, %v1800_v24, 0.0 }
0x1946   :  { %v1835_v47 = vsel %vm115_vm7, %v1834_v46, 0.0 }
0x1947   :  { %2365 = shalt.err (!%p2362_p2)
}
0x1948   :  { %s2366_s26 = scalar_lea.hbm %s2942_s8, 128 }
0x1949   :  { %p2367_p3 = scmp.ne.s32.totalorder %s2942_s8, %s2366_s26  ;;  %p2370_p4 = scmp.lt.u32.totalorder %s2366_s26, %s2942_s8 }
0x194b   :  { %p2372_p5 = pnand %p2370_p4, %p2367_p3 }
0x194d   :  { %2375 = shalt.err (!%p2372_p5)
}
0x194e   :  { %1853 = dma.vmem_to_hbm [thread:$0]  %s1851_s30, 128, %s2942_s8, [#allocation3]   ;;  %v1836_v57 = vrot.slane %v1835_v47, 4  ;;  %vm1842_vm14 = vcmask 253952  }
0x194f   :  { %s2422_s21 = smov [#allocation6]  }
0x1950   :  { %v1837_v49 = vadd.f32 %v1836_v57, %v1835_v47  ;;  %s1860_s4 = sshll.u32 %s2422_s21, 4  ;;  %s1861_s4 = int_to_ptr.vmem [resolvable:$true] %s1860_s4 }
0x1951   :  { %s2376_s6 = scalar_lea.vmem %s1861_s4, 16  ;;  %s2380_s22 = scalar_lea.vmem %s1861_s4, 32 }
0x1952   :  { %v1838_v50 = vrot.slane %v1837_v49, 2  ;;  %p2377_p6 = scmp.ne.s32.totalorder %s1861_s4, %s2376_s6  ;;  %p2381_p7 = scmp.lt.s32.totalorder %s1861_s4, %s1861_s4 }
0x1953   :  { %p2382_p8 = scmp.lt.s32.totalorder %s2380_s22, %s2376_s6 }
0x1954   :  { %v1839_v51 = vadd.f32 %v1838_v50, %v1837_v49 }
0x1955   :  { %p2383_p9 = por %p2382_p8, %p2381_p7 }
0x1956   :  { %v1840_v52 = vrot.slane %v1839_v51, 1 }
0x1957   :  { %p2384_p10 = pnand %p2383_p9, %p2377_p6 }
0x1958   :  { %v1841_v23 = vadd.f32 %v1840_v52, %v1839_v51 }
0x195a   :  { %1843 = vst.msk [vmem:[#allocation6] sm:$0x1] %vm1842_vm14, %v1841_v23 }
0x195b   :  { %2387 = shalt.err (!%p2384_p10)
}
0x195c   :  { %s2388_s23 = scalar_lea.hbm %s2943_s9, 16 }
0x195d   :  { %p2389_p11 = scmp.ne.s32.totalorder %s2943_s9, %s2388_s23  ;;  %p2392_p12 = scmp.lt.u32.totalorder %s2388_s23, %s2943_s9 }
0x195f   :  { %p2394_p13 = pnand %p2392_p12, %p2389_p11 }
0x1961   :  { %2397 = shalt.err (!%p2394_p13)
}
0x1962   :  { %1863 = dma.vmem_to_hbm [thread:$0]  %s1861_s4, 16, %s2943_s9, [#allocation7]  }
0x1963   :  { %2400 = dma.done.wait [#allocation3], 128  }
0x1964   :  { %2401 = vsyncadd [#allocation3], 4294967168 }
0x1965   :  { %2402 = dma.done.wait [#allocation7], 16  }
0x1966   :  { %2403 = vsyncadd [#allocation7], 4294967280 }
0x1967   :  { %1870 = vsyncpa [#allocation3], 1 }
0x1968   :  { %1871 = vsyncpa [#allocation7], 1 }
0x1969   :  { %1872 = vsyncpa [#allocation4], 1 }

</bundles_post_ra>
